<compile_context>
chip_gen: v7x
topology: tpu7x:2x2x1
jax: 0.10.0
libtpu: 0.0.40
codegen_flags: <defaults>
</compile_context>

<pallas_src>
import functools
import math

import jax
import jax.numpy as jnp
from jax import lax
from jax.experimental import pallas as pl
from jax.experimental.pallas import tpu as pltpu

_MXU_DTYPE = jnp.bfloat16  # operand dtype for MXU matmuls; accumulation is f32
_LN_EPS = 1e-5             # torch.nn.LayerNorm default


# ---------------------------------------------------------------------------
# Shared pure-jnp helpers (used both inside the kernel and in the reference).
# ---------------------------------------------------------------------------
def _layer_norm(x, gamma, beta, eps):
    mu = jnp.mean(x, axis=-1, keepdims=True)
    var = jnp.mean(jnp.square(x - mu), axis=-1, keepdims=True)
    return (x - mu) * lax.rsqrt(var + eps) * gamma + beta


def _gelu(x):
    # tanh approximation of GELU.
    # TODO(synk): nn.GELU() defaults to the exact erf form; difference is < 1e-3.
    c = math.sqrt(2.0 / math.pi)
    return 0.5 * x * (1.0 + jnp.tanh(c * (x + 0.044715 * x * x * x)))


# ---------------------------------------------------------------------------
# Fused kernel: pos_enc add + ContextAttentionBlock + MultiheadAttention +
#               residual/LN1 + MLP(GELU) + residual/LN2, Bb batch elems / step.
# ---------------------------------------------------------------------------
def _rat_layer_kernel(x_ref, pos_ref, w_qkv_ref, b_qkv_ref, hmat_ref,
                      w_in_ref, b_in_ref, w_out_ref, b_out_ref,
                      ln1_g_ref, ln1_b_ref, w1_ref, b1_ref, w2_ref, b2_ref,
                      ln2_g_ref, ln2_b_ref, o_ref,
                      *, tau, num_heads, head_dim, scale, eps):
    Bb, T, E = x_ref.shape
    H, hd = num_heads, head_dim
    R = Bb * T
    cdt = _MXU_DTYPE

    # xp = x + pos_enc (fused; never materialized in HBM)
    xp = x_ref[...] + pos_ref[...][None, :, :]                          # (Bb, T, E) f32
    xp2 = xp.reshape(R, E)

    # ---- head-layout helpers (all Bb*H heads batched together) ----------------
    def split_heads(v):                                                 # (R,E)->(Bb*H,T,hd)
        return v.reshape(Bb, T, H, hd).transpose(0, 2, 1, 3).reshape(Bb * H, T, hd)

    def merge_heads(v):                                                 # (Bb*H,T,hd)->(R,E)
        return v.reshape(Bb, H, T, hd).transpose(0, 2, 1, 3).reshape(R, E)

    def mha(q, k, v):
        # Per-head attention over the window; bf16 MXU operands, f32 accumulation.
        qh = split_heads(q).astype(cdt)
        kh = split_heads(k).astype(cdt)
        vh = split_heads(v).astype(cdt)
        s = jnp.einsum('hqd,hkd->hqk', qh, kh,
                       preferred_element_type=jnp.float32) * scale      # (Bb*H, T, T)
        m = jnp.max(s, axis=-1, keepdims=True)
        e = jnp.exp(s - m)
        p_attn = e * pl.reciprocal(jnp.sum(e, axis=-1, keepdims=True), approx=True)
        ctx = jnp.einsum('hqk,hkd->hqd', p_attn.astype(cdt), vh,
                         preferred_element_type=jnp.float32)            # (Bb*H, T, hd)
        return merge_heads(ctx)

    # ---- seq_attn == ContextAttentionBlock -----------------------------------
    # One fused MXU pass for the three projections (Wq | Wk | Wv).
    w_qkv = w_qkv_ref[...]                                              # (E, 3E) bf16
    b_qkv = b_qkv_ref[...]                                              # (1, 3E) f32
    proj = jnp.dot(xp2.astype(cdt), w_qkv,
                   preferred_element_type=jnp.float32) + b_qkv          # (R, 3E)
    qp = proj[:, :E]
    kp = proj[:, E:2 * E]
    vv = proj[:, 2 * E:]

    hmat = hmat_ref[...]                                                # (E, E) bf16 {0,1}
    row_in_b = lax.broadcasted_iota(jnp.int32, (Bb, T, E), 1).reshape(R, E)

    def banded_self_attn(p, bias_row):
        # CABlock(x, x, x) with a shared Linear: query t attends to the tau previous
        # positions; zero-pad rows project exactly to the bias and take part in the
        # softmax.  keys_j[t] = p[t - (tau - j)] (bias for out-of-range rows), built
        # with XLU rolls; only the tau-wide band of scores is ever formed.
        bias_full = jnp.broadcast_to(bias_row, (R, E))
        keys = [jnp.where(row_in_b < (tau - j), bias_full,
                          pltpu.roll(p, shift=tau - j, axis=0))
                for j in range(tau)]                                    # tau x (R, E)
        # Single MXU push for all tau shifts: per-head reduce (and broadcast back to
        # every lane of the head) via the precomputed (E, E) head-indicator matrix.
        prods = jnp.concatenate([p * k for k in keys], axis=0)          # (tau*R, E) f32
        s = jnp.dot(prods.astype(cdt), hmat,
                    preferred_element_type=jnp.float32) * scale         # (tau*R, E)
        s = s.reshape(tau, R, E)
        m = s[0]
        for j in range(1, tau):
            m = jnp.maximum(m, s[j])
        denom = jnp.zeros((R, E), jnp.float32)
        acc = jnp.zeros((R, E), jnp.float32)
        # tau is small; for large tau switch to an online-softmax fori_loop to bound
        # live ranges.
        for j in range(tau):
            e_j = jnp.exp(s[j] - m)
            denom = denom + e_j
            acc = acc + e_j * keys[j]                                   # values == keys
        return acc * pl.reciprocal(denom, approx=True)                  # (R, E)

    q_ca = banded_self_attn(qp, b_qkv[:, :E])
    k_ca = banded_self_attn(kp, b_qkv[:, E:2 * E])
    x1 = mha(q_ca, k_ca, vv)                                            # (R, E)

    # ---- rel_attn == nn.MultiheadAttention(x1, x1, x1), eval mode -------------
    # TODO(synk): the PyTorch module (batch_first=False) would treat dim 0 as sequence
    # and returns an (output, weights) tuple that the original forward adds to a tensor
    # (a bug); we implement the intended batch-first attention output only.
    w_in = w_in_ref[...]                                                # (E, 3E) bf16
    qkv = jnp.dot(x1.astype(cdt), w_in,
                  preferred_element_type=jnp.float32) + b_in_ref[...]   # (R, 3E)
    attn = mha(qkv[:, :E], qkv[:, E:2 * E], qkv[:, 2 * E:])
    w_out = w_out_ref[...]                                              # (E, E) bf16
    x2 = jnp.dot(attn.astype(cdt), w_out,
                 preferred_element_type=jnp.float32) + b_out_ref[...]   # (R, E)

    # ---- residual + LN1 + MLP(GELU) + residual + LN2 ---------------------------
    h = _layer_norm(xp2 + x2, ln1_g_ref[...], ln1_b_ref[...], eps)
    u = _gelu(jnp.dot(h.astype(cdt), w1_ref[...],
                      preferred_element_type=jnp.float32) + b1_ref[...])
    mlp = jnp.dot(u.astype(cdt), w2_ref[...],
                  preferred_element_type=jnp.float32) + b2_ref[...]
    y = _layer_norm(h + mlp, ln2_g_ref[...], ln2_b_ref[...], eps)
    o_ref[...] = y.reshape(Bb, T, E).astype(o_ref.dtype)                # one dense store


# ---------------------------------------------------------------------------
# Wrapper
# ---------------------------------------------------------------------------
def _pick_batch_block(batch, seq, row_target=256):
    """Batch elements per grid step: fill MXU sublanes; prefer an even grid (v7x 2 TCs)."""
    divisors = [d for d in range(1, batch + 1) if batch % d == 0]
    best = 1
    for d in divisors:
        if d * seq <= max(row_target, seq):
            best = d
    if (batch // best) % 2 == 1:
        for d in sorted(divisors, reverse=True):
            if d <= best and (batch // d) % 2 == 0 and 2 * d >= best:
                best = d
                break
    return best


def rat_encoder_layer_forward(x, params, *, num_heads, tau):
    """x: (B, T, E) f32; params: dict of f32 parameters. Returns (B, T, E) f32."""
    B, T, E = x.shape
    assert E % num_heads == 0, "embed_dim must be divisible by num_heads"
    assert tau >= 1, "tau must be >= 1 (tau == 0 would leave empty softmax rows)"
    assert params['pos_enc'].shape == (T, E), "num_tokens must equal window_size"
    hd = E // num_heads
    scale = float(hd) ** -0.5
    cdt = _MXU_DTYPE

    Bb = _pick_batch_block(B, T)

    # Host-side parameter packing (hoisted out of the kernel).
    w_qkv = jnp.concatenate([params['wq'].T, params['wk'].T, params['wv'].T],
                            axis=1).astype(cdt)                         # (E, 3E)
    b_qkv = jnp.concatenate([params['bq'], params['bk'], params['bv']]).reshape(1, 3 * E)
    head_ids = jnp.arange(E, dtype=jnp.int32) // hd
    hmat = (head_ids[:, None] == head_ids[None, :]).astype(cdt)         # (E, E) indicator
    w_in = params['w_in'].T.astype(cdt)                                 # (E, 3E)
    b_in = params['b_in'].reshape(1, 3 * E)
    w_out = params['w_out'].T.astype(cdt)                               # (E, E)
    b_out = params['b_out'].reshape(1, E)
    w1 = params['w_mlp1'].T.astype(cdt)                                 # (E, 4E)
    b1 = params['b_mlp1'].reshape(1, 4 * E)
    w2 = params['w_mlp2'].T.astype(cdt)                                 # (4E, E)
    b2 = params['b_mlp2'].reshape(1, E)
    g1 = params['ln1_g'].reshape(1, E)
    be1 = params['ln1_b'].reshape(1, E)
    g2 = params['ln2_g'].reshape(1, E)
    be2 = params['ln2_b'].reshape(1, E)

    kernel = functools.partial(_rat_layer_kernel, tau=tau, num_heads=num_heads,
                               head_dim=hd, scale=scale, eps=_LN_EPS)
    const2 = lambda b: (0, 0)
    y = pl.pallas_call(
        kernel,
        out_shape=jax.ShapeDtypeStruct((B, T, E), jnp.float32),
        grid_spec=pltpu.PrefetchScalarGridSpec(
            num_scalar_prefetch=0,
            grid=(B // Bb,),
            in_specs=[
                pl.BlockSpec((Bb, T, E), lambda b: (b, 0, 0)),   # x
                pl.BlockSpec((T, E), const2),                    # pos_enc
                pl.BlockSpec((E, 3 * E), const2),                # seq_attn W[q|k|v]^T
                pl.BlockSpec((1, 3 * E), const2),                # seq_attn biases
                pl.BlockSpec((E, E), const2),                    # head indicator
                pl.BlockSpec((E, 3 * E), const2),                # MHA in_proj^T
                pl.BlockSpec((1, 3 * E), const2),                # MHA in_proj bias
                pl.BlockSpec((E, E), const2),                    # MHA out_proj^T
                pl.BlockSpec((1, E), const2),                    # MHA out_proj bias
                pl.BlockSpec((1, E), const2),                    # LN1 gamma
                pl.BlockSpec((1, E), const2),                    # LN1 beta
                pl.BlockSpec((E, 4 * E), const2),                # MLP W1^T
                pl.BlockSpec((1, 4 * E), const2),                # MLP b1
                pl.BlockSpec((4 * E, E), const2),                # MLP W2^T
                pl.BlockSpec((1, E), const2),                    # MLP b2
                pl.BlockSpec((1, E), const2),                    # LN2 gamma
                pl.BlockSpec((1, E), const2),                    # LN2 beta
            ],
            out_specs=pl.BlockSpec((Bb, T, E), lambda b: (b, 0, 0)),
        ),
        compiler_params=pltpu.CompilerParams(
            dimension_semantics=("parallel",),
            vmem_limit_bytes=32 * 1024 * 1024,
        ),
    )(x, params['pos_enc'], w_qkv, b_qkv, hmat, w_in, b_in, w_out, b_out,
      g1, be1, w1, b1, w2, b2, g2, be2)
    return y


# ---------------------------------------------------------------------------
# Pure-JAX reference (independent structure, same bf16-operand matmul policy).
# ---------------------------------------------------------------------------
def _linear_ref(x, w_t, b):
    return jnp.dot(x.astype(w_t.dtype), w_t, preferred_element_type=jnp.float32) + b


def _cablock_ref(x, w, b, *, tau, num_heads):
    B, T, E = x.shape
    hd = E // num_heads
    scale = float(hd) ** -0.5
    p = _linear_ref(x, w.T.astype(_MXU_DTYPE), b)                       # (B, T, E)
    pad = jnp.broadcast_to(b, (B, tau, E)).astype(p.dtype)              # zero rows -> bias
    p_pad = jnp.concatenate([pad, p], axis=1)                           # (B, T+tau, E)
    idx = jnp.arange(T)[:, None] + jnp.arange(tau)[None, :]             # (T, tau)
    win = p_pad[:, idx]                                                 # (B, T, tau, E)
    qh = p.reshape(B, T, num_heads, hd)
    kh = win.reshape(B, T, tau, num_heads, hd)
    # Products rounded to bf16 before f32 accumulation: mirrors the kernel's
    # bf16-operand band matmul.
    prod = (qh[:, :, None] * kh).astype(_MXU_DTYPE).astype(jnp.float32)
    s = jnp.sum(prod, axis=-1) * scale                                  # (B, T, tau, H)
    a = jax.nn.softmax(s, axis=2)
    o = jnp.einsum('btjh,btjhd->bthd', a, kh)                           # values == keys
    return o.reshape(B, T, E)


def _mha_ref(q, k, v, num_heads):
    B, T, E = q.shape
    hd = E // num_heads
    scale = float(hd) ** -0.5

    def split(t):
        return t.reshape(B, T, num_heads, hd).transpose(0, 2, 1, 3)

    qh, kh, vh = split(q), split(k), split(v)
    s = jnp.einsum('bhqd,bhkd->bhqk', qh.astype(_MXU_DTYPE), kh.astype(_MXU_DTYPE),
                   preferred_element_type=jnp.float32) * scale
    a = jax.nn.softmax(s, axis=-1)
    o = jnp.einsum('bhqk,bhkd->bhqd', a.astype(_MXU_DTYPE), vh.astype(_MXU_DTYPE),
                   preferred_element_type=jnp.float32)
    return o.transpose(0, 2, 1, 3).reshape(B, T, E)


def rat_encoder_layer_reference(x, params, *, num_heads, tau):
    E = x.shape[-1]
    cdt = _MXU_DTYPE
    xp = x + params['pos_enc'][None]

    q = _cablock_ref(xp, params['wq'], params['bq'], tau=tau, num_heads=num_heads)
    k = _cablock_ref(xp, params['wk'], params['bk'], tau=tau, num_heads=num_heads)
    v = _linear_ref(xp, params['wv'].T.astype(cdt), params['bv'])
    x1 = _mha_ref(q, k, v, num_heads)

    qkv = _linear_ref(x1, params['w_in'].T.astype(cdt), params['b_in'])
    a2 = _mha_ref(qkv[..., :E], qkv[..., E:2 * E], qkv[..., 2 * E:], num_heads)
    x2 = _linear_ref(a2, params['w_out'].T.astype(cdt), params['b_out'])

    h = _layer_norm(xp + x2, params['ln1_g'], params['ln1_b'], _LN_EPS)
    u = _gelu(_linear_ref(h, params['w_mlp1'].T.astype(cdt), params['b_mlp1']))
    m = _linear_ref(u, params['w_mlp2'].T.astype(cdt), params['b_mlp2'])
    return _layer_norm(h + m, params['ln2_g'], params['ln2_b'], _LN_EPS)


if __name__ == "__main__":
    B, T, E = 2, 8, 32          # T == window_size (pos_enc is (window_size, E))
    NUM_HEADS, TAU = 4, 4

    rng = jax.random.split(jax.random.PRNGKey(0), 20)

    def dense(k, out_dim, in_dim):
        return jax.random.normal(k, (out_dim, in_dim), jnp.float32) * (in_dim ** -0.5)

    def vec(k, dim, s=0.1):
        return s * jax.random.normal(k, (dim,), jnp.float32)

    params = dict(
        pos_enc=0.5 * jax.random.normal(rng[0], (T, E), jnp.float32),
        wq=dense(rng[1], E, E), bq=vec(rng[2], E),
        wk=dense(rng[3], E, E), bk=vec(rng[4], E),
        wv=dense(rng[5], E, E), bv=vec(rng[6], E),
        w_in=dense(rng[7], 3 * E, E), b_in=vec(rng[8], 3 * E),
        w_out=dense(rng[9], E, E), b_out=vec(rng[10], E),
        ln1_g=1.0 + vec(rng[11], E, 0.05), ln1_b=vec(rng[12], E, 0.05),
        w_mlp1=dense(rng[13], 4 * E, E), b_mlp1=vec(rng[14], 4 * E),
        w_mlp2=dense(rng[15], E, 4 * E), b_mlp2=vec(rng[16], E),
        ln2_g=1.0 + vec(rng[17], E, 0.05), ln2_b=vec(rng[18], E, 0.05),
    )
    x = jax.random.normal(rng[19], (B, T, E), jnp.float32)

    out = rat_encoder_layer_forward(x, params, num_heads=NUM_HEADS, tau=TAU)
    out = jax.block_until_ready(out)

    ref = rat_encoder_layer_reference(x, params, num_heads=NUM_HEADS, tau=TAU)
    assert out.shape == (B, T, E)
    assert bool(jnp.all(jnp.isfinite(out)))
    # Tolerance covers the approx EUP reciprocal and bf16 MXU operand rounding (mirrored
    # in the reference); any structural bug produces O(1) errors on these LN-scaled outputs.
    assert jnp.allclose(out, ref, atol=3e-2, rtol=3e-2), (
        "mismatch vs reference: max abs diff = %r"
        % float(jnp.max(jnp.abs(out - ref))))
    print("KERNEL_OK")
</pallas_src>

<mosaic_0001>
module attributes {stable_mosaic.version = 11 : i64} {
  func.func @_rat_layer_kernel(%arg0: i32, %arg1: memref<1x8x32xf32, #tpu.memory_space<vmem>>, %arg2: memref<8x32xf32, #tpu.memory_space<vmem>>, %arg3: memref<32x96xbf16, #tpu.memory_space<vmem>>, %arg4: memref<1x96xf32, #tpu.memory_space<vmem>>, %arg5: memref<32x32xbf16, #tpu.memory_space<vmem>>, %arg6: memref<32x96xbf16, #tpu.memory_space<vmem>>, %arg7: memref<1x96xf32, #tpu.memory_space<vmem>>, %arg8: memref<32x32xbf16, #tpu.memory_space<vmem>>, %arg9: memref<1x32xf32, #tpu.memory_space<vmem>>, %arg10: memref<1x32xf32, #tpu.memory_space<vmem>>, %arg11: memref<1x32xf32, #tpu.memory_space<vmem>>, %arg12: memref<32x128xbf16, #tpu.memory_space<vmem>>, %arg13: memref<1x128xf32, #tpu.memory_space<vmem>>, %arg14: memref<128x32xbf16, #tpu.memory_space<vmem>>, %arg15: memref<1x32xf32, #tpu.memory_space<vmem>>, %arg16: memref<1x32xf32, #tpu.memory_space<vmem>>, %arg17: memref<1x32xf32, #tpu.memory_space<vmem>>, %arg18: memref<1x8x32xf32, #tpu.memory_space<vmem>>) attributes {dimension_semantics = [#tpu.dimension_semantics<parallel>], iteration_bounds = array<i64: 2>, scalar_prefetch = 0 : i64, scratch_operands = 0 : i64, tpu.core_type = #tpu.core_type<tc>, window_params = [{transform_indices = @transform_0, window_bounds = array<i64: 1, 8, 32>}, {pipeline_mode = #tpu.pipeline_mode<synchronous>, transform_indices = @transform_1, window_bounds = array<i64: 8, 32>}, {pipeline_mode = #tpu.pipeline_mode<synchronous>, transform_indices = @transform_2, window_bounds = array<i64: 32, 96>}, {pipeline_mode = #tpu.pipeline_mode<synchronous>, transform_indices = @transform_3, window_bounds = array<i64: 1, 96>}, {pipeline_mode = #tpu.pipeline_mode<synchronous>, transform_indices = @transform_4, window_bounds = array<i64: 32, 32>}, {pipeline_mode = #tpu.pipeline_mode<synchronous>, transform_indices = @transform_5, window_bounds = array<i64: 32, 96>}, {pipeline_mode = #tpu.pipeline_mode<synchronous>, transform_indices = @transform_6, window_bounds = array<i64: 1, 96>}, {pipeline_mode = #tpu.pipeline_mode<synchronous>, transform_indices = @transform_7, window_bounds = array<i64: 32, 32>}, {pipeline_mode = #tpu.pipeline_mode<synchronous>, transform_indices = @transform_8, window_bounds = array<i64: 1, 32>}, {pipeline_mode = #tpu.pipeline_mode<synchronous>, transform_indices = @transform_9, window_bounds = array<i64: 1, 32>}, {pipeline_mode = #tpu.pipeline_mode<synchronous>, transform_indices = @transform_10, window_bounds = array<i64: 1, 32>}, {pipeline_mode = #tpu.pipeline_mode<synchronous>, transform_indices = @transform_11, window_bounds = array<i64: 32, 128>}, {pipeline_mode = #tpu.pipeline_mode<synchronous>, transform_indices = @transform_12, window_bounds = array<i64: 1, 128>}, {pipeline_mode = #tpu.pipeline_mode<synchronous>, transform_indices = @transform_13, window_bounds = array<i64: 128, 32>}, {pipeline_mode = #tpu.pipeline_mode<synchronous>, transform_indices = @transform_14, window_bounds = array<i64: 1, 32>}, {pipeline_mode = #tpu.pipeline_mode<synchronous>, transform_indices = @transform_15, window_bounds = array<i64: 1, 32>}, {pipeline_mode = #tpu.pipeline_mode<synchronous>, transform_indices = @transform_16, window_bounds = array<i64: 1, 32>}, {transform_indices = @transform_17, window_bounds = array<i64: 1, 8, 32>}]} {
    %c0 = arith.constant 0 : index
    %c0_0 = arith.constant 0 : index
    %c0_1 = arith.constant 0 : index
    %0 = vector.load %arg1[%c0, %c0_0, %c0_1] : memref<1x8x32xf32, #tpu.memory_space<vmem>>, vector<1x8x32xf32>
    %c0_2 = arith.constant 0 : index
    %c0_3 = arith.constant 0 : index
    %1 = vector.load %arg2[%c0_2, %c0_3] : memref<8x32xf32, #tpu.memory_space<vmem>>, vector<8x32xf32>
    %2 = vector.shape_cast %1 : vector<8x32xf32> to vector<1x8x32xf32>
    %3 = arith.addf %0, %2 : vector<1x8x32xf32>
    %4 = vector.shape_cast %3 : vector<1x8x32xf32> to vector<8x32xf32>
    %c0_4 = arith.constant 0 : index
    %c0_5 = arith.constant 0 : index
    %5 = vector.load %arg3[%c0_4, %c0_5] : memref<32x96xbf16, #tpu.memory_space<vmem>>, vector<32x96xbf16>
    %c0_6 = arith.constant 0 : index
    %c0_7 = arith.constant 0 : index
    %6 = vector.load %arg4[%c0_6, %c0_7] : memref<1x96xf32, #tpu.memory_space<vmem>>, vector<1x96xf32>
    %7 = arith.truncf %4 : vector<8x32xf32> to vector<8x32xbf16>
    %cst = arith.constant dense<0.000000e+00> : vector<8x96xf32>
    %8 = tpu.matmul %7, %5, %cst {dimension_numbers = #tpu.dot_dimension_numbers<[1], [0], [0], [1], [0, 0, 1, 1], [], []>} : vector<8x32xbf16>, vector<32x96xbf16>, vector<8x96xf32> -> vector<8x96xf32>
    %9 = vector.broadcast %6 : vector<1x96xf32> to vector<8x96xf32>
    %10 = arith.addf %8, %9 : vector<8x96xf32>
    %11 = vector.extract_strided_slice %10 {offsets = [0, 0], sizes = [8, 32], strides = [1, 1]} : vector<8x96xf32> to vector<8x32xf32>
    %12 = vector.extract_strided_slice %10 {offsets = [0, 32], sizes = [8, 32], strides = [1, 1]} : vector<8x96xf32> to vector<8x32xf32>
    %13 = vector.extract_strided_slice %10 {offsets = [0, 64], sizes = [8, 32], strides = [1, 1]} : vector<8x96xf32> to vector<8x32xf32>
    %c0_8 = arith.constant 0 : index
    %c0_9 = arith.constant 0 : index
    %14 = vector.load %arg5[%c0_8, %c0_9] : memref<32x32xbf16, #tpu.memory_space<vmem>>, vector<32x32xbf16>
    %15 = tpu.iota {dimensions = array<i32: 1>} : vector<1x8x32xi32>
    %16 = vector.shape_cast %15 : vector<1x8x32xi32> to vector<8x32xi32>
    %17 = vector.extract_strided_slice %6 {offsets = [0, 0], sizes = [1, 32], strides = [1, 1]} : vector<1x96xf32> to vector<1x32xf32>
    %18 = vector.shape_cast %17 : vector<1x32xf32> to vector<1x32xf32>
    %19 = vector.broadcast %18 : vector<1x32xf32> to vector<8x32xf32>
    %c4_i32 = arith.constant 4 : i32
    %20 = vector.broadcast %c4_i32 : i32 to vector<8x32xi32>
    %21 = arith.cmpi slt, %16, %20 : vector<8x32xi32>
    %c4_i32_10 = arith.constant 4 : i32
    %22 = tpu.dynamic_rotate %11 by %c4_i32_10 dim 0 : vector<8x32xf32>, i32 -> vector<8x32xf32>
    %23 = arith.select %21, %19, %22 : vector<8x32xi1>, vector<8x32xf32>
    %c3_i32 = arith.constant 3 : i32
    %24 = vector.broadcast %c3_i32 : i32 to vector<8x32xi32>
    %25 = arith.cmpi slt, %16, %24 : vector<8x32xi32>
    %c3_i32_11 = arith.constant 3 : i32
    %26 = tpu.dynamic_rotate %11 by %c3_i32_11 dim 0 : vector<8x32xf32>, i32 -> vector<8x32xf32>
    %27 = arith.select %25, %19, %26 : vector<8x32xi1>, vector<8x32xf32>
    %c2_i32 = arith.constant 2 : i32
    %28 = vector.broadcast %c2_i32 : i32 to vector<8x32xi32>
    %29 = arith.cmpi slt, %16, %28 : vector<8x32xi32>
    %c2_i32_12 = arith.constant 2 : i32
    %30 = tpu.dynamic_rotate %11 by %c2_i32_12 dim 0 : vector<8x32xf32>, i32 -> vector<8x32xf32>
    %31 = arith.select %29, %19, %30 : vector<8x32xi1>, vector<8x32xf32>
    %c1_i32 = arith.constant 1 : i32
    %32 = vector.broadcast %c1_i32 : i32 to vector<8x32xi32>
    %33 = arith.cmpi slt, %16, %32 : vector<8x32xi32>
    %c1_i32_13 = arith.constant 1 : i32
    %34 = tpu.dynamic_rotate %11 by %c1_i32_13 dim 0 : vector<8x32xf32>, i32 -> vector<8x32xf32>
    %35 = arith.select %33, %19, %34 : vector<8x32xi1>, vector<8x32xf32>
    %36 = arith.mulf %11, %23 : vector<8x32xf32>
    %37 = arith.mulf %11, %27 : vector<8x32xf32>
    %38 = arith.mulf %11, %31 : vector<8x32xf32>
    %39 = arith.mulf %11, %35 : vector<8x32xf32>
    %40 = tpu.concatenate %36, %37, %38, %39 in 0 : vector<8x32xf32>, vector<8x32xf32>, vector<8x32xf32>, vector<8x32xf32> -> vector<32x32xf32>
    %41 = arith.truncf %40 : vector<32x32xf32> to vector<32x32xbf16>
    %cst_14 = arith.constant dense<0.000000e+00> : vector<32x32xf32>
    %42 = tpu.matmul %41, %14, %cst_14 {dimension_numbers = #tpu.dot_dimension_numbers<[1], [0], [0], [1], [0, 0, 1, 1], [], []>} : vector<32x32xbf16>, vector<32x32xbf16>, vector<32x32xf32> -> vector<32x32xf32>
    %cst_15 = arith.constant 0.353553385 : f32
    %43 = vector.broadcast %cst_15 : f32 to vector<32x32xf32>
    %44 = arith.mulf %42, %43 : vector<32x32xf32>
    %45 = vector.shape_cast %44 : vector<32x32xf32> to vector<4x8x32xf32>
    %46 = vector.extract_strided_slice %45 {offsets = [0, 0, 0], sizes = [1, 8, 32], strides = [1, 1, 1]} : vector<4x8x32xf32> to vector<1x8x32xf32>
    %47 = vector.shape_cast %46 : vector<1x8x32xf32> to vector<8x32xf32>
    %48 = vector.extract_strided_slice %45 {offsets = [1, 0, 0], sizes = [1, 8, 32], strides = [1, 1, 1]} : vector<4x8x32xf32> to vector<1x8x32xf32>
    %49 = vector.shape_cast %48 : vector<1x8x32xf32> to vector<8x32xf32>
    %50 = arith.maximumf %47, %49 : vector<8x32xf32>
    %51 = vector.extract_strided_slice %45 {offsets = [2, 0, 0], sizes = [1, 8, 32], strides = [1, 1, 1]} : vector<4x8x32xf32> to vector<1x8x32xf32>
    %52 = vector.shape_cast %51 : vector<1x8x32xf32> to vector<8x32xf32>
    %53 = arith.maximumf %50, %52 : vector<8x32xf32>
    %54 = vector.extract_strided_slice %45 {offsets = [3, 0, 0], sizes = [1, 8, 32], strides = [1, 1, 1]} : vector<4x8x32xf32> to vector<1x8x32xf32>
    %55 = vector.shape_cast %54 : vector<1x8x32xf32> to vector<8x32xf32>
    %56 = arith.maximumf %53, %55 : vector<8x32xf32>
    %cst_16 = arith.constant 0.000000e+00 : f32
    %57 = vector.broadcast %cst_16 : f32 to vector<8x32xf32>
    %cst_17 = arith.constant 0.000000e+00 : f32
    %58 = vector.broadcast %cst_17 : f32 to vector<8x32xf32>
    %59 = vector.extract_strided_slice %45 {offsets = [0, 0, 0], sizes = [1, 8, 32], strides = [1, 1, 1]} : vector<4x8x32xf32> to vector<1x8x32xf32>
    %60 = vector.shape_cast %59 : vector<1x8x32xf32> to vector<8x32xf32>
    %61 = arith.subf %60, %56 : vector<8x32xf32>
    %62 = math.exp %61 : vector<8x32xf32>
    %63 = arith.addf %57, %62 : vector<8x32xf32>
    %64 = arith.mulf %62, %23 : vector<8x32xf32>
    %65 = arith.addf %58, %64 : vector<8x32xf32>
    %66 = vector.extract_strided_slice %45 {offsets = [1, 0, 0], sizes = [1, 8, 32], strides = [1, 1, 1]} : vector<4x8x32xf32> to vector<1x8x32xf32>
    %67 = vector.shape_cast %66 : vector<1x8x32xf32> to vector<8x32xf32>
    %68 = arith.subf %67, %56 : vector<8x32xf32>
    %69 = math.exp %68 : vector<8x32xf32>
    %70 = arith.addf %63, %69 : vector<8x32xf32>
    %71 = arith.mulf %69, %27 : vector<8x32xf32>
    %72 = arith.addf %65, %71 : vector<8x32xf32>
    %73 = vector.extract_strided_slice %45 {offsets = [2, 0, 0], sizes = [1, 8, 32], strides = [1, 1, 1]} : vector<4x8x32xf32> to vector<1x8x32xf32>
    %74 = vector.shape_cast %73 : vector<1x8x32xf32> to vector<8x32xf32>
    %75 = arith.subf %74, %56 : vector<8x32xf32>
    %76 = math.exp %75 : vector<8x32xf32>
    %77 = arith.addf %70, %76 : vector<8x32xf32>
    %78 = arith.mulf %76, %31 : vector<8x32xf32>
    %79 = arith.addf %72, %78 : vector<8x32xf32>
    %80 = vector.extract_strided_slice %45 {offsets = [3, 0, 0], sizes = [1, 8, 32], strides = [1, 1, 1]} : vector<4x8x32xf32> to vector<1x8x32xf32>
    %81 = vector.shape_cast %80 : vector<1x8x32xf32> to vector<8x32xf32>
    %82 = arith.subf %81, %56 : vector<8x32xf32>
    %83 = math.exp %82 : vector<8x32xf32>
    %84 = arith.addf %77, %83 : vector<8x32xf32>
    %85 = arith.mulf %83, %35 : vector<8x32xf32>
    %86 = arith.addf %79, %85 : vector<8x32xf32>
    %87 = tpu.reciprocal %84 {approx = true} : vector<8x32xf32> -> vector<8x32xf32>
    %88 = arith.mulf %86, %87 : vector<8x32xf32>
    %89 = vector.extract_strided_slice %6 {offsets = [0, 32], sizes = [1, 32], strides = [1, 1]} : vector<1x96xf32> to vector<1x32xf32>
    %90 = vector.shape_cast %89 : vector<1x32xf32> to vector<1x32xf32>
    %91 = vector.broadcast %90 : vector<1x32xf32> to vector<8x32xf32>
    %c4_i32_18 = arith.constant 4 : i32
    %92 = vector.broadcast %c4_i32_18 : i32 to vector<8x32xi32>
    %93 = arith.cmpi slt, %16, %92 : vector<8x32xi32>
    %c4_i32_19 = arith.constant 4 : i32
    %94 = tpu.dynamic_rotate %12 by %c4_i32_19 dim 0 : vector<8x32xf32>, i32 -> vector<8x32xf32>
    %95 = arith.select %93, %91, %94 : vector<8x32xi1>, vector<8x32xf32>
    %c3_i32_20 = arith.constant 3 : i32
    %96 = vector.broadcast %c3_i32_20 : i32 to vector<8x32xi32>
    %97 = arith.cmpi slt, %16, %96 : vector<8x32xi32>
    %c3_i32_21 = arith.constant 3 : i32
    %98 = tpu.dynamic_rotate %12 by %c3_i32_21 dim 0 : vector<8x32xf32>, i32 -> vector<8x32xf32>
    %99 = arith.select %97, %91, %98 : vector<8x32xi1>, vector<8x32xf32>
    %c2_i32_22 = arith.constant 2 : i32
    %100 = vector.broadcast %c2_i32_22 : i32 to vector<8x32xi32>
    %101 = arith.cmpi slt, %16, %100 : vector<8x32xi32>
    %c2_i32_23 = arith.constant 2 : i32
    %102 = tpu.dynamic_rotate %12 by %c2_i32_23 dim 0 : vector<8x32xf32>, i32 -> vector<8x32xf32>
    %103 = arith.select %101, %91, %102 : vector<8x32xi1>, vector<8x32xf32>
    %c1_i32_24 = arith.constant 1 : i32
    %104 = vector.broadcast %c1_i32_24 : i32 to vector<8x32xi32>
    %105 = arith.cmpi slt, %16, %104 : vector<8x32xi32>
    %c1_i32_25 = arith.constant 1 : i32
    %106 = tpu.dynamic_rotate %12 by %c1_i32_25 dim 0 : vector<8x32xf32>, i32 -> vector<8x32xf32>
    %107 = arith.select %105, %91, %106 : vector<8x32xi1>, vector<8x32xf32>
    %108 = arith.mulf %12, %95 : vector<8x32xf32>
    %109 = arith.mulf %12, %99 : vector<8x32xf32>
    %110 = arith.mulf %12, %103 : vector<8x32xf32>
    %111 = arith.mulf %12, %107 : vector<8x32xf32>
    %112 = tpu.concatenate %108, %109, %110, %111 in 0 : vector<8x32xf32>, vector<8x32xf32>, vector<8x32xf32>, vector<8x32xf32> -> vector<32x32xf32>
    %113 = arith.truncf %112 : vector<32x32xf32> to vector<32x32xbf16>
    %cst_26 = arith.constant dense<0.000000e+00> : vector<32x32xf32>
    %114 = tpu.matmul %113, %14, %cst_26 {dimension_numbers = #tpu.dot_dimension_numbers<[1], [0], [0], [1], [0, 0, 1, 1], [], []>} : vector<32x32xbf16>, vector<32x32xbf16>, vector<32x32xf32> -> vector<32x32xf32>
    %cst_27 = arith.constant 0.353553385 : f32
    %115 = vector.broadcast %cst_27 : f32 to vector<32x32xf32>
    %116 = arith.mulf %114, %115 : vector<32x32xf32>
    %117 = vector.shape_cast %116 : vector<32x32xf32> to vector<4x8x32xf32>
    %118 = vector.extract_strided_slice %117 {offsets = [0, 0, 0], sizes = [1, 8, 32], strides = [1, 1, 1]} : vector<4x8x32xf32> to vector<1x8x32xf32>
    %119 = vector.shape_cast %118 : vector<1x8x32xf32> to vector<8x32xf32>
    %120 = vector.extract_strided_slice %117 {offsets = [1, 0, 0], sizes = [1, 8, 32], strides = [1, 1, 1]} : vector<4x8x32xf32> to vector<1x8x32xf32>
    %121 = vector.shape_cast %120 : vector<1x8x32xf32> to vector<8x32xf32>
    %122 = arith.maximumf %119, %121 : vector<8x32xf32>
    %123 = vector.extract_strided_slice %117 {offsets = [2, 0, 0], sizes = [1, 8, 32], strides = [1, 1, 1]} : vector<4x8x32xf32> to vector<1x8x32xf32>
    %124 = vector.shape_cast %123 : vector<1x8x32xf32> to vector<8x32xf32>
    %125 = arith.maximumf %122, %124 : vector<8x32xf32>
    %126 = vector.extract_strided_slice %117 {offsets = [3, 0, 0], sizes = [1, 8, 32], strides = [1, 1, 1]} : vector<4x8x32xf32> to vector<1x8x32xf32>
    %127 = vector.shape_cast %126 : vector<1x8x32xf32> to vector<8x32xf32>
    %128 = arith.maximumf %125, %127 : vector<8x32xf32>
    %cst_28 = arith.constant 0.000000e+00 : f32
    %129 = vector.broadcast %cst_28 : f32 to vector<8x32xf32>
    %cst_29 = arith.constant 0.000000e+00 : f32
    %130 = vector.broadcast %cst_29 : f32 to vector<8x32xf32>
    %131 = vector.extract_strided_slice %117 {offsets = [0, 0, 0], sizes = [1, 8, 32], strides = [1, 1, 1]} : vector<4x8x32xf32> to vector<1x8x32xf32>
    %132 = vector.shape_cast %131 : vector<1x8x32xf32> to vector<8x32xf32>
    %133 = arith.subf %132, %128 : vector<8x32xf32>
    %134 = math.exp %133 : vector<8x32xf32>
    %135 = arith.addf %129, %134 : vector<8x32xf32>
    %136 = arith.mulf %134, %95 : vector<8x32xf32>
    %137 = arith.addf %130, %136 : vector<8x32xf32>
    %138 = vector.extract_strided_slice %117 {offsets = [1, 0, 0], sizes = [1, 8, 32], strides = [1, 1, 1]} : vector<4x8x32xf32> to vector<1x8x32xf32>
    %139 = vector.shape_cast %138 : vector<1x8x32xf32> to vector<8x32xf32>
    %140 = arith.subf %139, %128 : vector<8x32xf32>
    %141 = math.exp %140 : vector<8x32xf32>
    %142 = arith.addf %135, %141 : vector<8x32xf32>
    %143 = arith.mulf %141, %99 : vector<8x32xf32>
    %144 = arith.addf %137, %143 : vector<8x32xf32>
    %145 = vector.extract_strided_slice %117 {offsets = [2, 0, 0], sizes = [1, 8, 32], strides = [1, 1, 1]} : vector<4x8x32xf32> to vector<1x8x32xf32>
    %146 = vector.shape_cast %145 : vector<1x8x32xf32> to vector<8x32xf32>
    %147 = arith.subf %146, %128 : vector<8x32xf32>
    %148 = math.exp %147 : vector<8x32xf32>
    %149 = arith.addf %142, %148 : vector<8x32xf32>
    %150 = arith.mulf %148, %103 : vector<8x32xf32>
    %151 = arith.addf %144, %150 : vector<8x32xf32>
    %152 = vector.extract_strided_slice %117 {offsets = [3, 0, 0], sizes = [1, 8, 32], strides = [1, 1, 1]} : vector<4x8x32xf32> to vector<1x8x32xf32>
    %153 = vector.shape_cast %152 : vector<1x8x32xf32> to vector<8x32xf32>
    %154 = arith.subf %153, %128 : vector<8x32xf32>
    %155 = math.exp %154 : vector<8x32xf32>
    %156 = arith.addf %149, %155 : vector<8x32xf32>
    %157 = arith.mulf %155, %107 : vector<8x32xf32>
    %158 = arith.addf %151, %157 : vector<8x32xf32>
    %159 = tpu.reciprocal %156 {approx = true} : vector<8x32xf32> -> vector<8x32xf32>
    %160 = arith.mulf %158, %159 : vector<8x32xf32>
    %161 = vector.shape_cast %88 : vector<8x32xf32> to vector<1x8x4x8xf32>
    %162 = tpu.transpose %161, [0, 2, 1, 3] : vector<1x8x4x8xf32> -> vector<1x4x8x8xf32>
    %163 = vector.shape_cast %162 : vector<1x4x8x8xf32> to vector<4x8x8xf32>
    %164 = arith.truncf %163 : vector<4x8x8xf32> to vector<4x8x8xbf16>
    %165 = vector.shape_cast %160 : vector<8x32xf32> to vector<1x8x4x8xf32>
    %166 = tpu.transpose %165, [0, 2, 1, 3] : vector<1x8x4x8xf32> -> vector<1x4x8x8xf32>
    %167 = vector.shape_cast %166 : vector<1x4x8x8xf32> to vector<4x8x8xf32>
    %168 = arith.truncf %167 : vector<4x8x8xf32> to vector<4x8x8xbf16>
    %169 = vector.shape_cast %13 : vector<8x32xf32> to vector<1x8x4x8xf32>
    %170 = tpu.transpose %169, [0, 2, 1, 3] : vector<1x8x4x8xf32> -> vector<1x4x8x8xf32>
    %171 = vector.shape_cast %170 : vector<1x4x8x8xf32> to vector<4x8x8xf32>
    %172 = arith.truncf %171 : vector<4x8x8xf32> to vector<4x8x8xbf16>
    "tpu.trace_start"() <{level = 10 : i32, message = "hqd,hkd->hqk"}> : () -> ()
    %cst_30 = arith.constant dense<0.000000e+00> : vector<4x8x8xf32>
    %173 = tpu.matmul %164, %168, %cst_30 {dimension_numbers = #tpu.dot_dimension_numbers<[2], [2], [1], [1], [0, 0, 0, 1, 1, 1], [0], [0]>} : vector<4x8x8xbf16>, vector<4x8x8xbf16>, vector<4x8x8xf32> -> vector<4x8x8xf32>
    "tpu.trace_stop"() : () -> ()
    %cst_31 = arith.constant 0.353553385 : f32
    %174 = vector.broadcast %cst_31 : f32 to vector<4x8x8xf32>
    %175 = arith.mulf %173, %174 : vector<4x8x8xf32>
    %cst_32 = arith.constant dense<0xFF800000> : vector<4x8xf32>
    %176 = vector.multi_reduction <maximumf>, %175, %cst_32 [2] : vector<4x8x8xf32> to vector<4x8xf32>
    %177 = vector.shape_cast %176 : vector<4x8xf32> to vector<4x8x1xf32>
    %178 = vector.broadcast %177 : vector<4x8x1xf32> to vector<4x8x8xf32>
    %179 = arith.subf %175, %178 : vector<4x8x8xf32>
    %180 = math.exp %179 : vector<4x8x8xf32>
    %cst_33 = arith.constant dense<0.000000e+00> : vector<4x8xf32>
    %181 = vector.multi_reduction <add>, %180, %cst_33 [2] : vector<4x8x8xf32> to vector<4x8xf32>
    %182 = vector.shape_cast %181 : vector<4x8xf32> to vector<4x8x1xf32>
    %183 = tpu.reciprocal %182 {approx = true} : vector<4x8x1xf32> -> vector<4x8x1xf32>
    %184 = vector.broadcast %183 : vector<4x8x1xf32> to vector<4x8x8xf32>
    %185 = arith.mulf %180, %184 : vector<4x8x8xf32>
    %186 = arith.truncf %185 : vector<4x8x8xf32> to vector<4x8x8xbf16>
    "tpu.trace_start"() <{level = 10 : i32, message = "hqk,hkd->hqd"}> : () -> ()
    %cst_34 = arith.constant dense<0.000000e+00> : vector<4x8x8xf32>
    %187 = tpu.matmul %186, %172, %cst_34 {dimension_numbers = #tpu.dot_dimension_numbers<[2], [1], [1], [2], [0, 0, 0, 1, 1, 2], [0], [0]>} : vector<4x8x8xbf16>, vector<4x8x8xbf16>, vector<4x8x8xf32> -> vector<4x8x8xf32>
    "tpu.trace_stop"() : () -> ()
    %188 = vector.shape_cast %187 : vector<4x8x8xf32> to vector<1x4x8x8xf32>
    %189 = tpu.transpose %188, [0, 2, 1, 3] : vector<1x4x8x8xf32> -> vector<1x8x4x8xf32>
    %190 = vector.shape_cast %189 : vector<1x8x4x8xf32> to vector<8x32xf32>
    %c0_35 = arith.constant 0 : index
    %c0_36 = arith.constant 0 : index
    %191 = vector.load %arg6[%c0_35, %c0_36] : memref<32x96xbf16, #tpu.memory_space<vmem>>, vector<32x96xbf16>
    %192 = arith.truncf %190 : vector<8x32xf32> to vector<8x32xbf16>
    %cst_37 = arith.constant dense<0.000000e+00> : vector<8x96xf32>
    %193 = tpu.matmul %192, %191, %cst_37 {dimension_numbers = #tpu.dot_dimension_numbers<[1], [0], [0], [1], [0, 0, 1, 1], [], []>} : vector<8x32xbf16>, vector<32x96xbf16>, vector<8x96xf32> -> vector<8x96xf32>
    %c0_38 = arith.constant 0 : index
    %c0_39 = arith.constant 0 : index
    %194 = vector.load %arg7[%c0_38, %c0_39] : memref<1x96xf32, #tpu.memory_space<vmem>>, vector<1x96xf32>
    %195 = vector.broadcast %194 : vector<1x96xf32> to vector<8x96xf32>
    %196 = arith.addf %193, %195 : vector<8x96xf32>
    %197 = vector.extract_strided_slice %196 {offsets = [0, 0], sizes = [8, 32], strides = [1, 1]} : vector<8x96xf32> to vector<8x32xf32>
    %198 = vector.extract_strided_slice %196 {offsets = [0, 32], sizes = [8, 32], strides = [1, 1]} : vector<8x96xf32> to vector<8x32xf32>
    %199 = vector.extract_strided_slice %196 {offsets = [0, 64], sizes = [8, 32], strides = [1, 1]} : vector<8x96xf32> to vector<8x32xf32>
    %200 = vector.shape_cast %197 : vector<8x32xf32> to vector<1x8x4x8xf32>
    %201 = tpu.transpose %200, [0, 2, 1, 3] : vector<1x8x4x8xf32> -> vector<1x4x8x8xf32>
    %202 = vector.shape_cast %201 : vector<1x4x8x8xf32> to vector<4x8x8xf32>
    %203 = arith.truncf %202 : vector<4x8x8xf32> to vector<4x8x8xbf16>
    %204 = vector.shape_cast %198 : vector<8x32xf32> to vector<1x8x4x8xf32>
    %205 = tpu.transpose %204, [0, 2, 1, 3] : vector<1x8x4x8xf32> -> vector<1x4x8x8xf32>
    %206 = vector.shape_cast %205 : vector<1x4x8x8xf32> to vector<4x8x8xf32>
    %207 = arith.truncf %206 : vector<4x8x8xf32> to vector<4x8x8xbf16>
    %208 = vector.shape_cast %199 : vector<8x32xf32> to vector<1x8x4x8xf32>
    %209 = tpu.transpose %208, [0, 2, 1, 3] : vector<1x8x4x8xf32> -> vector<1x4x8x8xf32>
    %210 = vector.shape_cast %209 : vector<1x4x8x8xf32> to vector<4x8x8xf32>
    %211 = arith.truncf %210 : vector<4x8x8xf32> to vector<4x8x8xbf16>
    "tpu.trace_start"() <{level = 10 : i32, message = "hqd,hkd->hqk"}> : () -> ()
    %cst_40 = arith.constant dense<0.000000e+00> : vector<4x8x8xf32>
    %212 = tpu.matmul %203, %207, %cst_40 {dimension_numbers = #tpu.dot_dimension_numbers<[2], [2], [1], [1], [0, 0, 0, 1, 1, 1], [0], [0]>} : vector<4x8x8xbf16>, vector<4x8x8xbf16>, vector<4x8x8xf32> -> vector<4x8x8xf32>
    "tpu.trace_stop"() : () -> ()
    %cst_41 = arith.constant 0.353553385 : f32
    %213 = vector.broadcast %cst_41 : f32 to vector<4x8x8xf32>
    %214 = arith.mulf %212, %213 : vector<4x8x8xf32>
    %cst_42 = arith.constant dense<0xFF800000> : vector<4x8xf32>
    %215 = vector.multi_reduction <maximumf>, %214, %cst_42 [2] : vector<4x8x8xf32> to vector<4x8xf32>
    %216 = vector.shape_cast %215 : vector<4x8xf32> to vector<4x8x1xf32>
    %217 = vector.broadcast %216 : vector<4x8x1xf32> to vector<4x8x8xf32>
    %218 = arith.subf %214, %217 : vector<4x8x8xf32>
    %219 = math.exp %218 : vector<4x8x8xf32>
    %cst_43 = arith.constant dense<0.000000e+00> : vector<4x8xf32>
    %220 = vector.multi_reduction <add>, %219, %cst_43 [2] : vector<4x8x8xf32> to vector<4x8xf32>
    %221 = vector.shape_cast %220 : vector<4x8xf32> to vector<4x8x1xf32>
    %222 = tpu.reciprocal %221 {approx = true} : vector<4x8x1xf32> -> vector<4x8x1xf32>
    %223 = vector.broadcast %222 : vector<4x8x1xf32> to vector<4x8x8xf32>
    %224 = arith.mulf %219, %223 : vector<4x8x8xf32>
    %225 = arith.truncf %224 : vector<4x8x8xf32> to vector<4x8x8xbf16>
    "tpu.trace_start"() <{level = 10 : i32, message = "hqk,hkd->hqd"}> : () -> ()
    %cst_44 = arith.constant dense<0.000000e+00> : vector<4x8x8xf32>
    %226 = tpu.matmul %225, %211, %cst_44 {dimension_numbers = #tpu.dot_dimension_numbers<[2], [1], [1], [2], [0, 0, 0, 1, 1, 2], [0], [0]>} : vector<4x8x8xbf16>, vector<4x8x8xbf16>, vector<4x8x8xf32> -> vector<4x8x8xf32>
    "tpu.trace_stop"() : () -> ()
    %227 = vector.shape_cast %226 : vector<4x8x8xf32> to vector<1x4x8x8xf32>
    %228 = tpu.transpose %227, [0, 2, 1, 3] : vector<1x4x8x8xf32> -> vector<1x8x4x8xf32>
    %229 = vector.shape_cast %228 : vector<1x8x4x8xf32> to vector<8x32xf32>
    %c0_45 = arith.constant 0 : index
    %c0_46 = arith.constant 0 : index
    %230 = vector.load %arg8[%c0_45, %c0_46] : memref<32x32xbf16, #tpu.memory_space<vmem>>, vector<32x32xbf16>
    %231 = arith.truncf %229 : vector<8x32xf32> to vector<8x32xbf16>
    %cst_47 = arith.constant dense<0.000000e+00> : vector<8x32xf32>
    %232 = tpu.matmul %231, %230, %cst_47 {dimension_numbers = #tpu.dot_dimension_numbers<[1], [0], [0], [1], [0, 0, 1, 1], [], []>} : vector<8x32xbf16>, vector<32x32xbf16>, vector<8x32xf32> -> vector<8x32xf32>
    %c0_48 = arith.constant 0 : index
    %c0_49 = arith.constant 0 : index
    %233 = vector.load %arg9[%c0_48, %c0_49] : memref<1x32xf32, #tpu.memory_space<vmem>>, vector<1x32xf32>
    %234 = vector.broadcast %233 : vector<1x32xf32> to vector<8x32xf32>
    %235 = arith.addf %232, %234 : vector<8x32xf32>
    %236 = arith.addf %4, %235 : vector<8x32xf32>
    %c0_50 = arith.constant 0 : index
    %c0_51 = arith.constant 0 : index
    %237 = vector.load %arg10[%c0_50, %c0_51] : memref<1x32xf32, #tpu.memory_space<vmem>>, vector<1x32xf32>
    %c0_52 = arith.constant 0 : index
    %c0_53 = arith.constant 0 : index
    %238 = vector.load %arg11[%c0_52, %c0_53] : memref<1x32xf32, #tpu.memory_space<vmem>>, vector<1x32xf32>
    %cst_54 = arith.constant dense<0.000000e+00> : vector<8xf32>
    %239 = vector.multi_reduction <add>, %236, %cst_54 [1] : vector<8x32xf32> to vector<8xf32>
    %240 = vector.shape_cast %239 : vector<8xf32> to vector<8x1xf32>
    %cst_55 = arith.constant 3.200000e+01 : f32
    %241 = vector.broadcast %cst_55 : f32 to vector<8x1xf32>
    %242 = arith.divf %240, %241 : vector<8x1xf32>
    %243 = vector.broadcast %242 : vector<8x1xf32> to vector<8x32xf32>
    %244 = arith.subf %236, %243 : vector<8x32xf32>
    %245 = arith.mulf %244, %244 : vector<8x32xf32>
    %cst_56 = arith.constant dense<0.000000e+00> : vector<8xf32>
    %246 = vector.multi_reduction <add>, %245, %cst_56 [1] : vector<8x32xf32> to vector<8xf32>
    %247 = vector.shape_cast %246 : vector<8xf32> to vector<8x1xf32>
    %cst_57 = arith.constant 3.200000e+01 : f32
    %248 = vector.broadcast %cst_57 : f32 to vector<8x1xf32>
    %249 = arith.divf %247, %248 : vector<8x1xf32>
    %250 = vector.broadcast %242 : vector<8x1xf32> to vector<8x32xf32>
    %251 = arith.subf %236, %250 : vector<8x32xf32>
    %cst_58 = arith.constant 9.99999974E-6 : f32
    %252 = vector.broadcast %cst_58 : f32 to vector<8x1xf32>
    %253 = arith.addf %249, %252 : vector<8x1xf32>
    %254 = math.rsqrt %253 : vector<8x1xf32>
    %255 = vector.broadcast %254 : vector<8x1xf32> to vector<8x32xf32>
    %256 = arith.mulf %251, %255 : vector<8x32xf32>
    %257 = vector.broadcast %237 : vector<1x32xf32> to vector<8x32xf32>
    %258 = arith.mulf %256, %257 : vector<8x32xf32>
    %259 = vector.broadcast %238 : vector<1x32xf32> to vector<8x32xf32>
    %260 = arith.addf %258, %259 : vector<8x32xf32>
    %261 = arith.truncf %260 : vector<8x32xf32> to vector<8x32xbf16>
    %c0_59 = arith.constant 0 : index
    %c0_60 = arith.constant 0 : index
    %262 = vector.load %arg12[%c0_59, %c0_60] : memref<32x128xbf16, #tpu.memory_space<vmem>>, vector<32x128xbf16>
    %cst_61 = arith.constant dense<0.000000e+00> : vector<8x128xf32>
    %263 = tpu.matmul %261, %262, %cst_61 {dimension_numbers = #tpu.dot_dimension_numbers<[1], [0], [0], [1], [0, 0, 1, 1], [], []>} : vector<8x32xbf16>, vector<32x128xbf16>, vector<8x128xf32> -> vector<8x128xf32>
    %c0_62 = arith.constant 0 : index
    %c0_63 = arith.constant 0 : index
    %264 = vector.load %arg13[%c0_62, %c0_63] : memref<1x128xf32, #tpu.memory_space<vmem>>, vector<1x128xf32>
    %265 = vector.broadcast %264 : vector<1x128xf32> to vector<8x128xf32>
    %266 = arith.addf %263, %265 : vector<8x128xf32>
    %cst_64 = arith.constant 5.000000e-01 : f32
    %267 = vector.broadcast %cst_64 : f32 to vector<8x128xf32>
    %268 = arith.mulf %267, %266 : vector<8x128xf32>
    %cst_65 = arith.constant 4.471500e-02 : f32
    %269 = vector.broadcast %cst_65 : f32 to vector<8x128xf32>
    %270 = arith.mulf %269, %266 : vector<8x128xf32>
    %271 = arith.mulf %270, %266 : vector<8x128xf32>
    %272 = arith.mulf %271, %266 : vector<8x128xf32>
    %273 = arith.addf %266, %272 : vector<8x128xf32>
    %cst_66 = arith.constant 0.797884583 : f32
    %274 = vector.broadcast %cst_66 : f32 to vector<8x128xf32>
    %275 = arith.mulf %274, %273 : vector<8x128xf32>
    %276 = math.tanh %275 : vector<8x128xf32>
    %cst_67 = arith.constant 1.000000e+00 : f32
    %277 = vector.broadcast %cst_67 : f32 to vector<8x128xf32>
    %278 = arith.addf %277, %276 : vector<8x128xf32>
    %279 = arith.mulf %268, %278 : vector<8x128xf32>
    %280 = arith.truncf %279 : vector<8x128xf32> to vector<8x128xbf16>
    %c0_68 = arith.constant 0 : index
    %c0_69 = arith.constant 0 : index
    %281 = vector.load %arg14[%c0_68, %c0_69] : memref<128x32xbf16, #tpu.memory_space<vmem>>, vector<128x32xbf16>
    %cst_70 = arith.constant dense<0.000000e+00> : vector<8x32xf32>
    %282 = tpu.matmul %280, %281, %cst_70 {dimension_numbers = #tpu.dot_dimension_numbers<[1], [0], [0], [1], [0, 0, 1, 1], [], []>} : vector<8x128xbf16>, vector<128x32xbf16>, vector<8x32xf32> -> vector<8x32xf32>
    %c0_71 = arith.constant 0 : index
    %c0_72 = arith.constant 0 : index
    %283 = vector.load %arg15[%c0_71, %c0_72] : memref<1x32xf32, #tpu.memory_space<vmem>>, vector<1x32xf32>
    %284 = vector.broadcast %283 : vector<1x32xf32> to vector<8x32xf32>
    %285 = arith.addf %282, %284 : vector<8x32xf32>
    %286 = arith.addf %260, %285 : vector<8x32xf32>
    %c0_73 = arith.constant 0 : index
    %c0_74 = arith.constant 0 : index
    %287 = vector.load %arg16[%c0_73, %c0_74] : memref<1x32xf32, #tpu.memory_space<vmem>>, vector<1x32xf32>
    %c0_75 = arith.constant 0 : index
    %c0_76 = arith.constant 0 : index
    %288 = vector.load %arg17[%c0_75, %c0_76] : memref<1x32xf32, #tpu.memory_space<vmem>>, vector<1x32xf32>
    %cst_77 = arith.constant dense<0.000000e+00> : vector<8xf32>
    %289 = vector.multi_reduction <add>, %286, %cst_77 [1] : vector<8x32xf32> to vector<8xf32>
    %290 = vector.shape_cast %289 : vector<8xf32> to vector<8x1xf32>
    %cst_78 = arith.constant 3.200000e+01 : f32
    %291 = vector.broadcast %cst_78 : f32 to vector<8x1xf32>
    %292 = arith.divf %290, %291 : vector<8x1xf32>
    %293 = vector.broadcast %292 : vector<8x1xf32> to vector<8x32xf32>
    %294 = arith.subf %286, %293 : vector<8x32xf32>
    %295 = arith.mulf %294, %294 : vector<8x32xf32>
    %cst_79 = arith.constant dense<0.000000e+00> : vector<8xf32>
    %296 = vector.multi_reduction <add>, %295, %cst_79 [1] : vector<8x32xf32> to vector<8xf32>
    %297 = vector.shape_cast %296 : vector<8xf32> to vector<8x1xf32>
    %cst_80 = arith.constant 3.200000e+01 : f32
    %298 = vector.broadcast %cst_80 : f32 to vector<8x1xf32>
    %299 = arith.divf %297, %298 : vector<8x1xf32>
    %300 = vector.broadcast %292 : vector<8x1xf32> to vector<8x32xf32>
    %301 = arith.subf %286, %300 : vector<8x32xf32>
    %cst_81 = arith.constant 9.99999974E-6 : f32
    %302 = vector.broadcast %cst_81 : f32 to vector<8x1xf32>
    %303 = arith.addf %299, %302 : vector<8x1xf32>
    %304 = math.rsqrt %303 : vector<8x1xf32>
    %305 = vector.broadcast %304 : vector<8x1xf32> to vector<8x32xf32>
    %306 = arith.mulf %301, %305 : vector<8x32xf32>
    %307 = vector.broadcast %287 : vector<1x32xf32> to vector<8x32xf32>
    %308 = arith.mulf %306, %307 : vector<8x32xf32>
    %309 = vector.broadcast %288 : vector<1x32xf32> to vector<8x32xf32>
    %310 = arith.addf %308, %309 : vector<8x32xf32>
    %311 = vector.shape_cast %310 : vector<8x32xf32> to vector<1x8x32xf32>
    %c0_82 = arith.constant 0 : index
    %c0_83 = arith.constant 0 : index
    %c0_84 = arith.constant 0 : index
    %312 = vector.load %arg18[%c0_82, %c0_83, %c0_84] : memref<1x8x32xf32, #tpu.memory_space<vmem>>, vector<1x8x32xf32>
    tpu.vector_store %arg18[%c0_82, %c0_83, %c0_84], %311 {strides = array<i32>} : memref<1x8x32xf32, #tpu.memory_space<vmem>>, vector<1x8x32xf32>,
    return
  }
  func.func @transform_0(%arg0: i32) -> (i32, i32, i32) {
    %c0_i32 = arith.constant 0 : i32
    %c0_i32_0 = arith.constant 0 : i32
    %c0_i32_1 = arith.constant 0 : i32
    return %arg0, %c0_i32, %c0_i32_0 : i32, i32, i32
  }
  func.func @transform_1(%arg0: i32) -> (i32, i32) {
    %c0_i32 = arith.constant 0 : i32
    %c0_i32_0 = arith.constant 0 : i32
    %c0_i32_1 = arith.constant 0 : i32
    return %c0_i32, %c0_i32_0 : i32, i32
  }
  func.func @transform_2(%arg0: i32) -> (i32, i32) {
    %c0_i32 = arith.constant 0 : i32
    %c0_i32_0 = arith.constant 0 : i32
    %c0_i32_1 = arith.constant 0 : i32
    return %c0_i32, %c0_i32_0 : i32, i32
  }
  func.func @transform_3(%arg0: i32) -> (i32, i32) {
    %c0_i32 = arith.constant 0 : i32
    %c0_i32_0 = arith.constant 0 : i32
    %c0_i32_1 = arith.constant 0 : i32
    return %c0_i32, %c0_i32_0 : i32, i32
  }
  func.func @transform_4(%arg0: i32) -> (i32, i32) {
    %c0_i32 = arith.constant 0 : i32
    %c0_i32_0 = arith.constant 0 : i32
    %c0_i32_1 = arith.constant 0 : i32
    return %c0_i32, %c0_i32_0 : i32, i32
  }
  func.func @transform_5(%arg0: i32) -> (i32, i32) {
    %c0_i32 = arith.constant 0 : i32
    %c0_i32_0 = arith.constant 0 : i32
    %c0_i32_1 = arith.constant 0 : i32
    return %c0_i32, %c0_i32_0 : i32, i32
  }
  func.func @transform_6(%arg0: i32) -> (i32, i32) {
    %c0_i32 = arith.constant 0 : i32
    %c0_i32_0 = arith.constant 0 : i32
    %c0_i32_1 = arith.constant 0 : i32
    return %c0_i32, %c0_i32_0 : i32, i32
  }
  func.func @transform_7(%arg0: i32) -> (i32, i32) {
    %c0_i32 = arith.constant 0 : i32
    %c0_i32_0 = arith.constant 0 : i32
    %c0_i32_1 = arith.constant 0 : i32
    return %c0_i32, %c0_i32_0 : i32, i32
  }
  func.func @transform_8(%arg0: i32) -> (i32, i32) {
    %c0_i32 = arith.constant 0 : i32
    %c0_i32_0 = arith.constant 0 : i32
    %c0_i32_1 = arith.constant 0 : i32
    return %c0_i32, %c0_i32_0 : i32, i32
  }
  func.func @transform_9(%arg0: i32) -> (i32, i32) {
    %c0_i32 = arith.constant 0 : i32
    %c0_i32_0 = arith.constant 0 : i32
    %c0_i32_1 = arith.constant 0 : i32
    return %c0_i32, %c0_i32_0 : i32, i32
  }
  func.func @transform_10(%arg0: i32) -> (i32, i32) {
    %c0_i32 = arith.constant 0 : i32
    %c0_i32_0 = arith.constant 0 : i32
    %c0_i32_1 = arith.constant 0 : i32
    return %c0_i32, %c0_i32_0 : i32, i32
  }
  func.func @transform_11(%arg0: i32) -> (i32, i32) {
    %c0_i32 = arith.constant 0 : i32
    %c0_i32_0 = arith.constant 0 : i32
    %c0_i32_1 = arith.constant 0 : i32
    return %c0_i32, %c0_i32_0 : i32, i32
  }
  func.func @transform_12(%arg0: i32) -> (i32, i32) {
    %c0_i32 = arith.constant 0 : i32
    %c0_i32_0 = arith.constant 0 : i32
    %c0_i32_1 = arith.constant 0 : i32
    return %c0_i32, %c0_i32_0 : i32, i32
  }
  func.func @transform_13(%arg0: i32) -> (i32, i32) {
    %c0_i32 = arith.constant 0 : i32
    %c0_i32_0 = arith.constant 0 : i32
    %c0_i32_1 = arith.constant 0 : i32
    return %c0_i32, %c0_i32_0 : i32, i32
  }
  func.func @transform_14(%arg0: i32) -> (i32, i32) {
    %c0_i32 = arith.constant 0 : i32
    %c0_i32_0 = arith.constant 0 : i32
    %c0_i32_1 = arith.constant 0 : i32
    return %c0_i32, %c0_i32_0 : i32, i32
  }
  func.func @transform_15(%arg0: i32) -> (i32, i32) {
    %c0_i32 = arith.constant 0 : i32
    %c0_i32_0 = arith.constant 0 : i32
    %c0_i32_1 = arith.constant 0 : i32
    return %c0_i32, %c0_i32_0 : i32, i32
  }
  func.func @transform_16(%arg0: i32) -> (i32, i32) {
    %c0_i32 = arith.constant 0 : i32
    %c0_i32_0 = arith.constant 0 : i32
    %c0_i32_1 = arith.constant 0 : i32
    return %c0_i32, %c0_i32_0 : i32, i32
  }
  func.func @transform_17(%arg0: i32) -> (i32, i32, i32) {
    %c0_i32 = arith.constant 0 : i32
    %c0_i32_0 = arith.constant 0 : i32
    %c0_i32_1 = arith.constant 0 : i32
    return %arg0, %c0_i32, %c0_i32_0 : i32, i32, i32
  }
}

</mosaic_0001>

<bundles_post_ra>
// kernel: tpu_custom_call.1
= control target key start
LH: loop header
LB: loop body
LE: loop exit
PB: predicated region body
PF: predicated region fallthrough
CT: control target
= control target key end

     0   :  { %s4922_s0 = inlined_call_operand.vmem [shape: f32[2,8,32], index: 0, kind: input, shape index: {}]   ;;  %s4923_s1 = inlined_call_operand.hbm [shape: f32[8,32], index: 1, kind: input, shape index: {}]   ;;  %s4924_s2 = inlined_call_operand.vmem [shape: bf16[32,96], index: 2, kind: input, shape index: {}]   ;;  %s4925_s3 = inlined_call_operand.vmem [shape: f32[1,96], index: 3, kind: input, shape index: {}]   ;;  %s4926_s4 = inlined_call_operand.vmem [shape: bf16[32,32], index: 4, kind: input, shape index: {}]   ;;  %s4927_s5 = inlined_call_operand.vmem [shape: bf16[32,96], index: 5, kind: input, shape index: {}]   ;;  %s4928_s6 = inlined_call_operand.vmem [shape: f32[1,96], index: 6, kind: input, shape index: {}]   ;;  %s4929_s7 = inlined_call_operand.vmem [shape: bf16[32,32], index: 7, kind: input, shape index: {}]   ;;  %s4930_s8 = inlined_call_operand.hbm [shape: f32[1,32], index: 8, kind: input, shape index: {}]   ;;  %s4931_s9 = inlined_call_operand.hbm [shape: f32[1,32], index: 9, kind: input, shape index: {}]   ;;  %s4932_s10 = inlined_call_operand.vmem [shape: f32[1,32], index: 10, kind: input, shape index: {}]   ;;  %s4933_s11 = inlined_call_operand.vmem [shape: bf16[32,128], index: 11, kind: input, shape index: {}]   ;;  %s4934_s12 = inlined_call_operand.vmem [shape: f32[1,128], index: 12, kind: input, shape index: {}]   ;;  %s4935_s13 = inlined_call_operand.vmem [shape: bf16[128,32], index: 13, kind: input, shape index: {}]   ;;  %s4936_s14 = inlined_call_operand.vmem [shape: f32[1,32], index: 14, kind: input, shape index: {}]   ;;  %s4937_s15 = inlined_call_operand.vmem [shape: f32[1,32], index: 15, kind: input, shape index: {}]   ;;  %s4938_s16 = inlined_call_operand.vmem [shape: f32[1,32], index: 16, kind: input, shape index: {}]   ;;  %s4939_s17 = inlined_call_operand.hbm [shape: f32[2,8,32], index: 17, kind: output, shape index: {}]  }
   0x1   :  { %4953 = sst [smem:[#allocation19_spill]] %s4922_s0 }
   0x2   :  { %4954 = sst [smem:[#allocation20_spill]] %s4923_s1 }
   0x3   :  { %4955 = sst [smem:[#allocation21_spill]] %s4924_s2 }
   0x4   :  { %4956 = sst [smem:[#allocation22_spill]] %s4925_s3 }
   0x5   :  { %4957 = sst [smem:[#allocation23_spill]] %s4937_s15 }
   0x6   :  { %4958 = sst [smem:[#allocation24_spill]] %s4938_s16 }
   0x7   :  { %4959 = sst [smem:[#allocation25_spill]] %s4939_s17 }
   0x8   :  { %22 = vsyncpa [#allocation3], 0 }
   0x9   :  { %23 = vsyncpa [#allocation6], 0 }
   0xa   :  { %24 = vsyncpa [#allocation4], 0 }
   0xb   :  { %26 = vsyncpa [#allocation4 + $0x1], 0  ;;  %s4198_s24 = smov 0   ;;  %s4200_s25 = smov 0  }
   0xc   :  { %s4202_s26 = smov 0   ;;  %s4204_s27 = smov 0  }
   0xd LB: > { %4960 = sst [smem:[#allocation12_spill]] %s4077_s24  ;;  %s4219_s28 = sadd.s32 4294967295, %s4089_s27   ;;  %s4089_s27 = sphi %s4204_s27, %s4991_s27   ;;  %s4085_s26 = sphi %s4202_s26, %s4993_s26   ;;  %s4081_s25 = sphi %s4200_s25, %s4995_s25   ;;  %s4077_s24 = sphi %s4198_s24, %s4994_s24  }
   0xe   : > { %4961 = sst [smem:[#allocation13_spill]] %s4085_s26  ;;  %s3468_s29 = sadd.s32 4294967294, %s4089_s27  }
   0xf   : > { %4962 = sst [smem:[#allocation14_spill]] %s4089_s27  ;;  %s4223_s0 = sadd.s32 1, %s4089_s27  }
  0x10   : > { %4963 = sst [smem:[#allocation15_spill]] %s4223_s0  ;;  %s401_s30 = sadd.s32 1, %s4085_s26 }
  0x11   : > { %s398_s18 = ssub.s32 %s4089_s27, %s4223_s0  ;;  %p411_p0 = scmp.ne.s32.totalorder %s4085_s26, %s4081_s25 }
  0x12   : > { %p399_p1 = scmp.eq.s32.totalorder %s398_s18, 0  ;;  %p412_p2 = scmp.eq.s32.totalorder %s4219_s28, 1 }
  0x13   : > { %p417_p3 = scmp.ne.s32.totalorder %s4081_s25, %s4077_s24  ;;  %p418_p4 = scmp.eq.s32.totalorder %s3468_s29, 1 }
  0x14   : > { %s4234_s19 = scalar_select %p399_p1, %s4085_s26, %s401_s30  }
  0x15   : > { %p4236_p5 = por %p412_p2, %p411_p0  ;;  %p4240_p6 = por %p418_p4, %p417_p3 }
  0x16   : > { %4964 = sst [smem:[#allocation16_spill]] %s4234_s19  ;;  %p3469_p7 = scmp.ge.s32.totalorder %s4089_s27, 1 }
  0x17   : > { %s4965_s1 = scalar_select %p4236_p5, 1, 0 }
  0x18   : > { %s4967_s20 = scalar_select %p4240_p6, 1, 0 }
  0x19   : > { %4966 = sst [smem:[#allocation17_spill]] %s4965_s1  ;;  %p425_p8 = scmp.lt.s32.totalorder %s4089_s27, 3 }
  0x1a   : > { %4968 = sst [smem:[#allocation18_spill]] %s4967_s20  ;;  %p4948_p9 = scmp.eq.s32.totalorder %s4219_s28, 0 }
  0x1b   : > { %p4247_p10 = pnand %p3469_p7, %p425_p8  ;;  %s4091_s22 = smov [#allocation5]  }
  0x1c   : > { %s467_s23 = sshll.u32 %s4091_s22, 4  ;;  %s4092_s29 = smov [#allocation2]   ;;  %s468_s23 = int_to_ptr.vmem [resolvable:$true] %s467_s23 }
  0x1d   : > { %s4969_s21 = scalar_select %p4247_p10, 1, 0 }
  0x1e   : > { %p3790_p11 = pneg %p4247_p10  ;;  %s438_s30 = sshll.u32 %s4092_s29, 4  ;;  %s4259_s30 = int_to_ptr.vmem [resolvable:$true] %s438_s30 }
  0x1f   : > { %s4093_s19 = smov [#allocation7]   ;;  %s3935_s22 = scalar_lea.hbm %s4930_s8, 16 }
  0x20   : > { %p4255_p12 = pnand %p4948_p9, %p3790_p11  ;;  %s478_s26 = sshll.u32 %s4093_s19, 4  ;;  %s4261_s26 = int_to_ptr.vmem [resolvable:$true] %s478_s26 }
  0x21   : > { %p3936_p13 = scmp.ne.s32.totalorder %s4930_s8, %s3935_s22  ;;  %p3942_p3 = scmp.lt.u32.totalorder %s3935_s22, %s4930_s8 }
  0x22   : > { %p4271_p0 = pneg %p4255_p12 }
  0x24   : > { %p3938_p1 = pnand %p4271_p0, %p3936_p13 }
  0x26   : > { %p3939_p2 = pneg %p3938_p1 }
  0x28   : > { %p3944_p4 = pnand %p3942_p3, %p3939_p2 }
  0x2a   : > { %3947 = shalt.err (!%p3944_p4)
}
  0x2b   : > { %s3948_s0 = scalar_lea.vmem %s468_s23, 16  ;;  %s3955_s24 = scalar_lea.vmem %s468_s23, 32 }
  0x2c   : > { %p3949_p7 = scmp.ne.s32.totalorder %s468_s23, %s3948_s0  ;;  %p3956_p9 = scmp.lt.s32.totalorder %s468_s23, %s468_s23 }
  0x2d   : > { %p3957_p6 = scmp.lt.s32.totalorder %s3955_s24, %s3948_s0 }
  0x2e   : > { %p3951_p8 = pnand %p3949_p7, %p4271_p0 }
  0x2f   : > { %p3958_p5 = por %p3957_p6, %p3956_p9 }
  0x30   : > { %p3952_p11 = pneg %p3951_p8 }
  0x32   : > { %p3959_p10 = pnand %p3958_p5, %p3952_p11 }
  0x34   : > { %3962 = shalt.err (!%p3959_p10)
}
  0x35   : > { %3796 = dma.hbm_to_vmem [thread:$0]  (!%p4255_p12), %s4930_s8, 16, %s468_s23, [#allocation6]  }
  0x36   : > { %s4972_s19 = sld [smem:[#allocation20_spill]] }
  0x3c   : > { %s3963_s16 = scalar_lea.hbm %s4972_s19, 128 }
  0x3d   : > { %p3964_p13 = scmp.ne.s32.totalorder %s4972_s19, %s3963_s16  ;;  %p3970_p5 = scmp.lt.u32.totalorder %s3963_s16, %s4972_s19 }
  0x3f   : > { %p3966_p1 = pnand %p3964_p13, %p4271_p0 }
  0x41   : > { %p3967_p6 = pneg %p3966_p1 }
  0x43   : > { %p3972_p9 = pnand %p3970_p5, %p3967_p6 }
  0x45   : > { %3975 = shalt.err (!%p3972_p9)
}
  0x46   : > { %s3976_s23 = scalar_lea.vmem %s4259_s30, 128  ;;  %p3984_p4 = scmp.lt.s32.totalorder %s4259_s30, %s4259_s30 }
  0x47   : > { %p3977_p10 = scmp.ne.s32.totalorder %s4259_s30, %s3976_s23  ;;  %p3985_p7 = scmp.lt.s32.totalorder %s3976_s23, %s3976_s23 }
  0x49   : > { %p3979_p2 = pnand %p3977_p10, %p4271_p0  ;;  %p3986_p8 = por %p3985_p7, %p3984_p4 }
  0x4b   : > { %p3980_p3 = pneg %p3979_p2 }
  0x4d   : > { %p3987_p11 = pnand %p3986_p8, %p3980_p3 }
  0x4f   : > { %3990 = shalt.err (!%p3987_p11)
}
  0x50   : > { %3793 = dma.hbm_to_vmem [thread:$0]  (!%p4255_p12), %s4972_s19, 128, %s4259_s30, [#allocation3]  }
  0x51   : > { %s3991_s20 = scalar_lea.hbm %s4931_s9, 16 }
  0x52   : > { %p3992_p13 = scmp.ne.s32.totalorder %s4931_s9, %s3991_s20  ;;  %p3998_p5 = scmp.lt.u32.totalorder %s3991_s20, %s4931_s9 }
  0x54   : > { %p3994_p1 = pnand %p3992_p13, %p4271_p0 }
  0x56   : > { %p3995_p6 = pneg %p3994_p1 }
  0x58   : > { %p4000_p9 = pnand %p3998_p5, %p3995_p6 }
  0x5a   : > { %4003 = shalt.err (!%p4000_p9)
}
  0x5b   : > { %s4004_s30 = scalar_lea.vmem %s4261_s26, 16  ;;  %s4011_s23 = scalar_lea.vmem %s4261_s26, 32 }
  0x5c   : > { %p4005_p10 = scmp.ne.s32.totalorder %s4261_s26, %s4004_s30  ;;  %p4012_p4 = scmp.lt.s32.totalorder %s4261_s26, %s4261_s26 }
  0x5d   : > { %p4013_p7 = scmp.lt.s32.totalorder %s4011_s23, %s4004_s30 }
  0x5e   : > { %p4007_p2 = pnand %p4005_p10, %p4271_p0 }
  0x5f   : > { %p4014_p8 = por %p4013_p7, %p4012_p4 }
  0x60   : > { %p4008_p3 = pneg %p4007_p2 }
  0x62   : > { %p4015_p11 = pnand %p4014_p8, %p4008_p3 }
  0x64   : > { %4018 = shalt.err (!%p4015_p11)
}
  0x65   : > { %3799 = dma.hbm_to_vmem [thread:$0]  (!%p4255_p12), %s4931_s9, 16, %s4261_s26, [#allocation6]  }
  0x66   : > { %p4973_p13 = scmp.ne.s32.totalorder %s4969_s21, 0 }
  0x67   : > { %p4974_p0 = scmp.eq.s32.totalorder (!%p4973_p13), %s4219_s28, 0 }
  0x68   : > { %519 = sbr.rel (%p4973_p13) target bundleno = 4771 (0x12a3), region = 88 }
  0x6f   : > { %4064 = dma.done.wait (%p4974_p0), [#allocation3], 128   ;;  %p4975_p1 = pmov %p4974_p0 }
  0x70   : > { %p4976_p6 = pmov %p4974_p0 }
  0x71   : > { %4066 = vsyncadd (%p4975_p1), [#allocation3], 4294967168 }
  0x72   : > { %4068 = dma.done.wait (%p4976_p6), [#allocation6], 32   ;;  %p4977_p5 = pmov %p4974_p0 }
  0x73   : > { %p578_p9 = scmp.lt.s32.totalorder %s4219_s28, 1  ;;  %v4094_v0 = vmov 0.0   ;;  %vm4095_vm0 = vmmov 0   ;;  %s4978_s1 = sld [smem:[#allocation19_spill]]  ;;  %v584_v4 = vld [vmem:[#allocation2] sm:$0xff]  ;;  %vm610_vm1 = vcmask 261120   ;;  %v658_v9 = vlaneseq }
  0x74   : > { %4070 = vsyncadd (%p4977_p5), [#allocation6], 4294967264  ;;  %3612 = vmatprep.subr.bf16.mxu1 %v4094_v0  ;;  %3616 = vmatprep.mubr.msk.bf16.mxu1 %vm4095_vm0, %v4094_v0  ;;  %s4979_s2 = sld [smem:[#allocation21_spill]]  ;;  %v3861_v7 = vld [vmem:[%s4926_s4] sm:$0xff]   ;;  %v3862_v8 = vld [vmem:[%s4926_s4 + $0x8] sm:$0xff]   ;;  %s4980_s3 = sld [smem:[#allocation22_spill]] }
  0x75   : > { %s579_s26 = scalar_select %p578_p9, %s4219_s28, 1  ;;  %3642 = vmatprep.subr.bf16.mxu0 %v4094_v0  ;;  %3644 = vmatprep.mubr.msk.bf16.mxu0 %vm4095_vm0, %v4094_v0  ;;  %v4378_v11 = vshrl.u32 %v658_v9, 7  ;;  %vm1380_vm6 = vcmask 64512   ;;  %vm1620_vm7 = vcmask 1043456   ;;  %vm1951_vm8 = vcmask 130048  }
  0x76   : > { %s4097_s18 = smov 32   ;;  %s4098_s29 = smov 112   ;;  %vm1953_vm9 = vcmask 195584  }
  0x77   : > { %s3479_s21 = sshll.u32 %s579_s26, 3  ;;  %vm660_vm2 = vcmp.lt.s32.totalorder %v4378_v11, 4  ;;  %vm663_vm3 = vcmp.lt.s32.totalorder %v4378_v11, 3  ;;  %vm666_vm4 = vcmp.lt.s32.totalorder %v4378_v11, 2  ;;  %vm669_vm5 = vcmp.lt.s32.totalorder %v4378_v11, 1  ;;  %s4103_s20 = smov 64  }
  0x78   : > { %s4104_s30 = smov 16   ;;  %s4105_s23 = smov 8  }
  0x79   : > { %s581_s27 = scalar_lea.vmem %s4978_s1, %s3479_s21  ;;  %s4096_s21 = smov 96  }
  0x7a   : > { %v3859_v1 = vld [vmem:[%s4979_s2] sm:$0xff]   ;;  %v3860_v2 = vld [vmem:[%s4979_s2 + $0x8] sm:$0xff]   ;;  %s4099_s1 = smov 120   ;;  %s4106_s15 = smov 24  }
  0x7b   : > { %3613 = vmatpush3.bf16.msra.mxu1 %v3859_v1  ;;  %v583_v3 = vld [vmem:[%s581_s27] sm:$0xff]  ;;  %s4100_s27 = smov 104   ;;  %s4983_s0 = sld [smem:[#allocation24_spill]] }
  0x7c   : > { %3614 = vmatprep.subr.bf16.mxu1 %v4094_v0  ;;  %v4362_v5 = vadd.f32 %v584_v4, %v583_v3  ;;  %v4376_v10 = vld [vmem:[%s4980_s3] ss:$0 sm:$0xff]  ;;  %s3548_s24 = sshll.u32 %s4219_s28, 7  ;;  %s4984_s26 = sld [smem:[#allocation25_spill]] }
  0x7d   : > { %s4107_s28 = smov [#allocation8]  }
  0x7e   : > { %v591_v6 = vpack.c.bf16 %v4362_v5, %v4362_v5 }
  0x7f   : > { %3615 = vmatpush3.bf16.msra.mxu1 %v3860_v2 }
  0x80   : > { %3620 = vmatprep.subr.bf16.mxu1 %v3861_v7 }
  0x82   : > { %3617 = vmatmul.mubr.msk.bf16.vlgmr.msra.gmra.mrb[0].mxu1 %vm610_vm1, %v591_v6  ;;  %s4985_s2 = smov %s4984_s26  ;;  %s4879_s3 = scalar_lea.hbm %s4984_s26, %s3548_s24 }
  0x83   : > { %3621 = vmatpush3.bf16.msra.mxu1 %v3861_v7 }
  0x84   : > { %3622 = vmatprep.subr.bf16.mxu1 %v3862_v8 }
  0x87   : > { %3623 = vmatpush3.bf16.msra.mxu1 %v3862_v8 }
  0x88   : > { %3628 = vmatprep.subr.bf16.mxu1 %v3861_v7 }
 0x155   : > { %v648_v12 = vpop.f32.mrb[0].mxu1 }
 0x156   : > { %v4381_v13 = vadd.f32 %v4376_v10, %v648_v12  ;;  %v3618_v14 = vpop.f32.mrb[1].mxu1 }
 0x157   : > { %v651_v15 = vpop.f32.mrb[2].mxu1 }
 0x158   : > { %779 = vrot.lane.b32.xlu0 %v4381_v13, %s4096_s21  ;;  %v3619_v16 = vpop.f32.mrb[3].mxu1  ;;  %v661_v17 = vrot.slane %v4381_v13, 4  ;;  %v664_v18 = vrot.slane %v4381_v13, 5  ;;  %v667_v19 = vrot.slane %v4381_v13, 6  ;;  %v670_v20 = vrot.slane %v4381_v13, 7 }
 0x15a   : > { %v4396_v21 = vsel %vm660_vm2, %v4376_v10, %v661_v17  ;;  %v4401_v22 = vsel %vm663_vm3, %v4376_v10, %v664_v18  ;;  %v4406_v23 = vsel %vm666_vm4, %v4376_v10, %v667_v19  ;;  %v4411_v24 = vsel %vm669_vm5, %v4376_v10, %v670_v20 }
 0x15b   : > { %v672_v25 = vmul.f32 %v4396_v21, %v4381_v13  ;;  %v673_v26 = vmul.f32 %v4401_v22, %v4381_v13  ;;  %v674_v27 = vmul.f32 %v4406_v23, %v4381_v13  ;;  %v675_v28 = vmul.f32 %v4411_v24, %v4381_v13 }
 0x15d   : > { %v676_v29 = vpack.c.bf16 %v673_v26, %v672_v25  ;;  %v677_v30 = vpack.c.bf16 %v675_v28, %v674_v27 }
 0x15f   : > { %3624 = vmatprep.mubr.msk.bf16.mxu1 %vm610_vm1, %v676_v29 }
 0x160   : > { %3625 = vmatmul.mubr.msk.bf16.vlgmr.msra.gmra.mrb[4].mxu1 %vm610_vm1, %v677_v30 }
 0x161   : > { %3629 = vmatpush3.bf16.msra.mxu1 %v3861_v7 }
 0x162   : > { %3630 = vmatprep.subr.bf16.mxu1 %v3862_v8 }
 0x165   : > { %3631 = vmatpush3.bf16.msra.mxu1 %v3862_v8 }
 0x166   : > { %3636 = vmatprep.subr.bf16.mxu1 %v4094_v0 }
 0x1ca   : > { %v780_v31 = vpop.permute.xlu0 %779 }
 0x1cb   : > { %v788_v32 = vrot.slane %v780_v31, 5  ;;  %v782_v33 = vrot.slane %v780_v31, 4  ;;  %v794_v34 = vrot.slane %v780_v31, 6  ;;  %v800_v35 = vrot.slane %v780_v31, 7 }
 0x1cd   : > { %790 = vrot.lane.b32.xlu1 %v788_v32, %s4097_s18  ;;  %784 = vrot.lane.b32.xlu0 %v782_v33, %s4097_s18 }
 0x1d1   : > { %796 = vrot.lane.b32.xlu1 %v794_v34, %s4097_s18  ;;  %802 = vrot.lane.b32.xlu0 %v800_v35, %s4097_s18 }
 0x233   : > { %v3626_v36 = vpop.f32.mrb[4].mxu1 }
 0x234   : > { %v730_v37 = vpop.f32.mrb[5].mxu1  ;;  %v747_v42 = vmul.f32 0.35355338, %v3626_v36 }
 0x235   : > { %v3627_v38 = vpop.f32.mrb[6].mxu1  ;;  %v745_v40 = vmul.f32 0.35355338, %v730_v37 }
 0x236   : > { %v733_v39 = vpop.f32.mrb[7].mxu1  ;;  %v748_v44 = vmul.f32 0.35355338, %v3627_v38 }
 0x237   : > { %v746_v41 = vmul.f32 0.35355338, %v733_v39 }
 0x239   : > { %v749_v43 = vmax.f32 %v745_v40, %v746_v41 }
 0x23b   : > { %v750_v45 = vmax.f32 %v749_v43, %v747_v42 }
 0x23d   : > { %v751_v46 = vmax.f32 %v750_v45, %v748_v44 }
 0x23f   : > { %v752_v47 = vsub.f32 %v745_v40, %v751_v46  ;;  %v758_v48 = vsub.f32 %v746_v41, %v751_v46  ;;  %v764_v49 = vsub.f32 %v747_v42, %v751_v46  ;;  %v770_v50 = vsub.f32 %v748_v44, %v751_v46  ;;  %v791_v51 = vpop.permute.xlu1 %790  ;;  %v785_v52 = vpop.permute.xlu0 %784 }
 0x240   : > { %v793_v53 = vsel %vm663_vm3, %v4376_v10, %v791_v51  ;;  %v787_v54 = vsel %vm660_vm2, %v4376_v10, %v785_v52 }
 0x241   : > { %v753_v55 = vmul.f32 1.442695, %v752_v47  ;;  %v759_v56 = vmul.f32 1.442695, %v758_v48  ;;  %v765_v57 = vmul.f32 1.442695, %v764_v49  ;;  %v807_v58 = vmul.f32 %v793_v53, %v4381_v13 }
 0x242   : > { %v771_v59 = vmul.f32 1.442695, %v770_v50  ;;  %v806_v60 = vmul.f32 %v787_v54, %v4381_v13 }
 0x243   : > { %3877 = vpow2.f32 %v753_v55  ;;  %v797_v61 = vpop.permute.xlu1 %796  ;;  %v803_v62 = vpop.permute.xlu0 %802 }
 0x244   : > { %3879 = vpow2.f32 %v759_v56  ;;  %v799_v63 = vsel %vm666_vm4, %v4376_v10, %v797_v61  ;;  %v805_v1 = vsel %vm669_vm5, %v4376_v10, %v803_v62  ;;  %v810_v2 = vpack.c.bf16 %v807_v58, %v806_v60 }
 0x245   : > { %3881 = vpow2.f32 %v765_v57  ;;  %v808_v3 = vmul.f32 %v799_v63, %v4381_v13  ;;  %v809_v4 = vmul.f32 %v805_v1, %v4381_v13 }
 0x246   : > { %3883 = vpow2.f32 %v771_v59  ;;  %814 = vrot.lane.b32.xlu1 %v810_v2, %s4096_s21 }
 0x247   : > { %v811_v6 = vpack.c.bf16 %v809_v4, %v808_v3  ;;  %v4101_v3 = vmov 1983009808  }
 0x248   : > { %v935_v4 = vunpack.c.l.s4 %v4101_v3 }
 0x249   : > { %816 = vrot.lane.b32.xlu0 %v811_v6, %s4096_s21  ;;  %v4102_v6 = vmov 1934713408  }
 0x24a   : > { %885 = vrot.lane.b32.xlu1 %v787_v54, %s4096_s21 }
 0x24d   : > { %v3878_v7 = vpop.eup %3877  ;;  %895 = vrot.lane.b32.xlu0 %v793_v53, %s4096_s21 }
 0x24e   : > { %v3880_v8 = vpop.eup %3879  ;;  %v756_v9 = vmul.f32 %v3878_v7, %v4396_v21  ;;  %905 = vrot.lane.b32.xlu1 %v799_v63, %s4096_s21 }
 0x24f   : > { %v3882_v10 = vpop.eup %3881  ;;  %v761_v12 = vadd.f32 %v3880_v8, %v3878_v7  ;;  %v762_v14 = vmul.f32 %v3880_v8, %v4401_v22  ;;  %v967_v7 = vunpack.c.l.s4 %v4102_v6  ;;  %v936_v8 = vunpack.c.0.s8 %v935_v4 }
 0x250   : > { %v3884_v15 = vpop.eup %3883  ;;  %v768_v18 = vmul.f32 %v3882_v10, %v4406_v23 }
 0x251   : > { %v763_v16 = vadd.f32 %v762_v14, %v756_v9  ;;  %v767_v17 = vadd.f32 %v3882_v10, %v761_v12  ;;  %915 = vrot.lane.b32.xlu0 %v805_v1, %s4096_s21  ;;  %v774_v25 = vmul.f32 %v3884_v15, %v4411_v24  ;;  %v968_v12 = vunpack.c.0.s8 %v967_v7 }
 0x252   : > { %v4472_v14 = vsub.s32 %v936_v8, %v4378_v11 }
 0x253   : > { %v773_v19 = vadd.f32 %v3884_v15, %v767_v17  ;;  %v769_v20 = vadd.f32 %v768_v18, %v763_v16 }
 0x255   : > { %3885 = vrcp.f32 %v773_v19  ;;  %v775_v26 = vadd.f32 %v774_v25, %v769_v20  ;;  %v4475_v25 = vsub.s32 %v968_v12, %v4378_v11 }
 0x25f   : > { %v3886_v21 = vpop.eup %3885 }
 0x260   : > { %v4450_v27 = vmul.f32 %v3886_v21, %v775_v26 }
 0x2b8   : > { %v815_v28 = vpop.permute.xlu1 %814 }
 0x2b9   : > { %3632 = vmatprep.mubr.msk.bf16.mxu1 %vm610_vm1, %v815_v28 }
 0x2bb   : > { %v817_v22 = vpop.permute.xlu0 %816 }
 0x2bc   : > { %3633 = vmatmul.mubr.msk.bf16.vlgmr.msra.gmra.mrb[8].mxu1 %vm610_vm1, %v817_v22  ;;  %v886_v46 = vpop.permute.xlu1 %885 }
 0x2bd   : > { %3638 = vmatprep.mubr.msk.bf16.mxu1 %vm4095_vm0, %v4094_v0 }
 0x2bf   : > { %v896_v47 = vpop.permute.xlu0 %895 }
 0x2c0   : > { %v906_v55 = vpop.permute.xlu1 %905 }
 0x2c3   : > { %v916_v59 = vpop.permute.xlu0 %915 }
 0x38f   : > { %v3634_v29 = vpop.f32.mrb[8].mxu1 }
 0x390   : > { %v858_v23 = vpop.f32.mrb[9].mxu1  ;;  %v875_v33 = vmul.f32 0.35355338, %v3634_v29 }
 0x391   : > { %v3635_v30 = vpop.f32.mrb[10].mxu1  ;;  %v873_v32 = vmul.f32 0.35355338, %v858_v23 }
 0x392   : > { %v861_v31 = vpop.f32.mrb[11].mxu1  ;;  %v876_v35 = vmul.f32 0.35355338, %v3635_v30 }
 0x393   : > { %v874_v24 = vmul.f32 0.35355338, %v861_v31 }
 0x395   : > { %v877_v34 = vmax.f32 %v873_v32, %v874_v24 }
 0x397   : > { %v878_v36 = vmax.f32 %v877_v34, %v875_v33 }
 0x399   : > { %v879_v37 = vmax.f32 %v878_v36, %v876_v35 }
 0x39b   : > { %v880_v38 = vsub.f32 %v873_v32, %v879_v37  ;;  %v890_v39 = vsub.f32 %v874_v24, %v879_v37  ;;  %v900_v40 = vsub.f32 %v875_v33, %v879_v37  ;;  %v910_v41 = vsub.f32 %v876_v35, %v879_v37 }
 0x39d   : > { %v881_v42 = vmul.f32 1.442695, %v880_v38  ;;  %v891_v43 = vmul.f32 1.442695, %v890_v39  ;;  %v901_v44 = vmul.f32 1.442695, %v900_v40 }
 0x39e   : > { %v911_v45 = vmul.f32 1.442695, %v910_v41 }
 0x39f   : > { %3887 = vpow2.f32 %v881_v42 }
 0x3a0   : > { %3889 = vpow2.f32 %v891_v43 }
 0x3a1   : > { %3891 = vpow2.f32 %v901_v44 }
 0x3a2   : > { %3893 = vpow2.f32 %v911_v45 }
 0x3a9   : > { %v3888_v48 = vpop.eup %3887 }
 0x3aa   : > { %v3890_v49 = vpop.eup %3889  ;;  %v888_v50 = vmul.f32 %v3888_v48, %v886_v46 }
 0x3ab   : > { %v3892_v51 = vpop.eup %3891  ;;  %v893_v52 = vadd.f32 %v3890_v49, %v3888_v48  ;;  %v898_v53 = vmul.f32 %v3890_v49, %v896_v47 }
 0x3ac   : > { %v3894_v54 = vpop.eup %3893  ;;  %v908_v58 = vmul.f32 %v3892_v51, %v906_v55 }
 0x3ad   : > { %v899_v56 = vadd.f32 %v898_v53, %v888_v50  ;;  %v903_v57 = vadd.f32 %v3892_v51, %v893_v52  ;;  %v918_v62 = vmul.f32 %v3894_v54, %v916_v59 }
 0x3af   : > { %v913_v60 = vadd.f32 %v3894_v54, %v903_v57  ;;  %v909_v61 = vadd.f32 %v908_v58, %v899_v56 }
 0x3b1   : > { %3895 = vrcp.f32 %v913_v60  ;;  %v919_v63 = vadd.f32 %v918_v62, %v909_v61 }
 0x3bb   : > { %v3896_v1 = vpop.eup %3895 }
 0x3bc   : > { %v921_v2 = vmul.f32 %v3896_v1, %v919_v63 }
 0x3be   : > { %1076 = vrot.lane.b32.xlu0 %v921_v2, %s4098_s29  ;;  %1073 = vrot.lane.b32.xlu1 %v921_v2, %s4099_s1 }
 0x3c2   : > { %1079 = vrot.lane.b32.xlu1 %v921_v2, %s4100_s27  ;;  %923 = vrot.lane.b32.xlu0 %v4450_v27, %s4099_s1 }
 0x3c6   : > { %926 = vrot.lane.b32.xlu1 %v4450_v27, %s4098_s29  ;;  %929 = vrot.lane.b32.xlu0 %v4450_v27, %s4100_s27 }
 0x3ca   : > { %1224 = vrot.lane.b32.xlu1 %v4381_v13, %s4098_s29  ;;  %1222 = vrot.lane.b32.xlu0 %v4381_v13, %s4099_s1 }
 0x3ce   : > { %1226 = vrot.lane.b32.xlu1 %v4381_v13, %s4100_s27 }
 0x430   : > { %v1077_v9 = vpop.permute.xlu0 %1076  ;;  %v1074_v10 = vpop.permute.xlu1 %1073 }
 0x431   : > { %v1082_v15 = vcombine.low %v921_v2, %v1077_v9  ;;  %v1083_v16 = vcombine.high %v921_v2, %v1077_v9 }
 0x433   : > { %v1090_v26 = vrot.slane %v1082_v15, %v4472_v14  ;;  %v1097_v21 = vrot.slane %v1083_v16, %v4472_v14 }
 0x434   : > { %v1080_v17 = vpop.permute.xlu1 %1079  ;;  %v924_v18 = vpop.permute.xlu0 %923 }
 0x435   : > { %v1098_v19 = vcombine.low %v1074_v10, %v1080_v17  ;;  %v1099_v20 = vcombine.high %v1074_v10, %v1080_v17 }
 0x437   : > { %v1106_v28 = vrot.slane %v1098_v19, %v4472_v14  ;;  %v1113_v22 = vrot.slane %v1099_v20, %v4472_v14 }
 0x438   : > { %v927_v29 = vpop.permute.xlu1 %926  ;;  %v930_v23 = vpop.permute.xlu0 %929 }
 0x439   : > { %v1114_v30 = vcombine.low %v1090_v26, %v1106_v28  ;;  %v1115_v31 = vcombine.high %v1090_v26, %v1106_v28  ;;  %v1130_v32 = vcombine.low %v1097_v21, %v1113_v22  ;;  %v1131_v24 = vcombine.high %v1097_v21, %v1113_v22 }
 0x43a   : > { %v932_v33 = vcombine.low %v4450_v27, %v927_v29  ;;  %v933_v34 = vcombine.high %v4450_v27, %v927_v29  ;;  %v948_v11 = vcombine.low %v924_v18, %v930_v23  ;;  %v949_v35 = vcombine.high %v924_v18, %v930_v23 }
 0x43b   : > { %v1122_v36 = vrot.slane %v1114_v30, %v4475_v25  ;;  %v1129_v37 = vrot.slane %v1115_v31, %v4475_v25  ;;  %v1138_v38 = vrot.slane %v1130_v32, %v4475_v25  ;;  %v1145_v39 = vrot.slane %v1131_v24, %v4475_v25 }
 0x43c   : > { %v940_v40 = vrot.slane %v932_v33, %v4472_v14  ;;  %v947_v41 = vrot.slane %v933_v34, %v4472_v14  ;;  %v956_v42 = vrot.slane %v948_v11, %v4472_v14  ;;  %v963_v43 = vrot.slane %v949_v35, %v4472_v14 }
 0x43d   : > { %v1150_v44 = vcombine.low %v1122_v36, %v1129_v37  ;;  %v3492_v27 = vcombine.high %v1122_v36, %v1129_v37  ;;  %v1166_v45 = vcombine.low %v1138_v38, %v1145_v39  ;;  %v3493_v46 = vcombine.high %v1138_v38, %v1145_v39 }
 0x43e   : > { %v964_v47 = vcombine.low %v940_v40, %v956_v42  ;;  %v965_v48 = vcombine.high %v940_v40, %v956_v42  ;;  %v980_v49 = vcombine.low %v947_v41, %v963_v43  ;;  %v981_v50 = vcombine.high %v947_v41, %v963_v43 }
 0x43f   : > { %v1157_v51 = vrot.slane %v1150_v44, %v4472_v14  ;;  %v1165_v52 = vrot.slane %v3492_v27, %v4472_v14  ;;  %v1173_v53 = vrot.slane %v1166_v45, %v4472_v14  ;;  %v1181_v54 = vrot.slane %v3493_v46, %v4472_v14 }
 0x440   : > { %v972_v55 = vrot.slane %v964_v47, %v4475_v25  ;;  %v979_v56 = vrot.slane %v965_v48, %v4475_v25  ;;  %v988_v57 = vrot.slane %v980_v49, %v4475_v25  ;;  %v995_v58 = vrot.slane %v981_v50, %v4475_v25 }
 0x441   : > { %v1182_v59 = vcombine.low %v1157_v51, %v1165_v52  ;;  %v1198_v60 = vcombine.low %v1173_v53, %v1181_v54  ;;  %v1183_v61 = vcombine.high %v1157_v51, %v1165_v52  ;;  %v1199_v62 = vcombine.high %v1173_v53, %v1181_v54 }
 0x442   : > { %v1000_v63 = vcombine.low %v972_v55, %v979_v56  ;;  %v3490_v1 = vcombine.high %v972_v55, %v979_v56  ;;  %v1016_v2 = vcombine.low %v988_v57, %v995_v58  ;;  %v3491_v3 = vcombine.high %v988_v57, %v995_v58 }
 0x443   : > { %v1190_v4 = vrot.slane %v1182_v59, %v4475_v25  ;;  %v1206_v6 = vrot.slane %v1198_v60, %v4475_v25  ;;  %v1197_v16 = vrot.slane %v1183_v61, %v4475_v25  ;;  %v1213_v17 = vrot.slane %v1199_v62, %v4475_v25 }
 0x444   : > { %v1007_v7 = vrot.slane %v1000_v63, %v4472_v14  ;;  %v1015_v8 = vrot.slane %v3490_v1, %v4472_v14  ;;  %v1023_v9 = vrot.slane %v1016_v2, %v4472_v14  ;;  %v1031_v10 = vrot.slane %v3491_v3, %v4472_v14 }
 0x445   : > { %v1214_v12 = vcombine.low %v1190_v4, %v1206_v6  ;;  %v1215_v15 = vcombine.high %v1190_v4, %v1206_v6  ;;  %v1216_v23 = vcombine.low %v1197_v16, %v1213_v17  ;;  %v1217_v30 = vcombine.high %v1197_v16, %v1213_v17  ;;  %v1223_v6 = vpop.permute.xlu0 %1222 }
 0x446   : > { %v1032_v18 = vcombine.low %v1007_v7, %v1015_v8  ;;  %v1048_v19 = vcombine.low %v1023_v9, %v1031_v10  ;;  %v1033_v31 = vcombine.high %v1007_v7, %v1015_v8  ;;  %v1049_v32 = vcombine.high %v1023_v9, %v1031_v10  ;;  %v1225_v7 = vpop.permute.xlu1 %1224 }
 0x447   : > { %v1218_v20 = vpack.c.bf16 %v1214_v12, %v1214_v12  ;;  %v1219_v26 = vpack.c.bf16 %v1215_v15, %v1215_v15  ;;  %v1220_v34 = vpack.c.bf16 %v1216_v23, %v1216_v23  ;;  %v1221_v11 = vpack.c.bf16 %v1217_v30, %v1217_v30 }
 0x448   : > { %v1040_v21 = vrot.slane %v1032_v18, %v4475_v25  ;;  %v1056_v28 = vrot.slane %v1048_v19, %v4475_v25  ;;  %v1047_v37 = vrot.slane %v1033_v31, %v4475_v25  ;;  %v1063_v38 = vrot.slane %v1049_v32, %v4475_v25 }
 0x449   : > { %v1385_v22 = vsel %vm1380_vm6, %v1218_v20, 0  ;;  %v1431_v29 = vsel %vm1380_vm6, %v1219_v26, 0  ;;  %v1477_v39 = vsel %vm1380_vm6, %v1220_v34, 0  ;;  %v1523_v40 = vsel %vm1380_vm6, %v1221_v11, 0 }
 0x44a   : > { %3637 = vmatpush3.bf16.xpose.msra.mxu1 %v1385_v22  ;;  %3643 = vmatpush3.bf16.xpose.msra.mxu0 %v1431_v29  ;;  %v1064_v24 = vcombine.low %v1040_v21, %v1056_v28  ;;  %v1065_v33 = vcombine.high %v1040_v21, %v1056_v28  ;;  %v1066_v41 = vcombine.low %v1047_v37, %v1063_v38  ;;  %v1227_v8 = vpop.permute.xlu1 %1226 }
 0x44b   : > { %3648 = vmatprep.subr.bf16.mxu1 %v4094_v0  ;;  %3654 = vmatprep.subr.bf16.mxu0 %v4094_v0  ;;  %v1067_v42 = vcombine.high %v1047_v37, %v1063_v38 }
 0x44c   : > { %v1068_v35 = vpack.c.bf16 %v1064_v24, %v1064_v24  ;;  %v1069_v36 = vpack.c.bf16 %v1065_v33, %v1065_v33  ;;  %v1070_v43 = vpack.c.bf16 %v1066_v41, %v1066_v41 }
 0x44d   : > { %v1071_v44 = vpack.c.bf16 %v1067_v42, %v1067_v42 }
 0x451   : > { %3639 = vmatmul.mubr.msk.bf16.vlgmr.msra.gmra.mrb[12].mxu1 %vm1380_vm6, %v1068_v35  ;;  %3645 = vmatmul.mubr.msk.bf16.vlgmr.msra.gmra.mrb[0].mxu0 %vm1380_vm6, %v1069_v36 }
 0x452   : > { %3649 = vmatpush3.bf16.xpose.msra.mxu1 %v1477_v39  ;;  %3655 = vmatpush3.bf16.xpose.msra.mxu0 %v1523_v40 }
 0x453   : > { %3650 = vmatprep.mubr.msk.bf16.mxu1 %vm4095_vm0, %v4094_v0  ;;  %3656 = vmatprep.mubr.msk.bf16.mxu0 %vm4095_vm0, %v4094_v0 }
 0x454   : > { %3660 = vmatprep.subr.bf16.mxu1 %v4094_v0  ;;  %3666 = vmatprep.subr.bf16.mxu0 %v4094_v0 }
 0x459   : > { %3651 = vmatmul.mubr.msk.bf16.vlgmr.msra.gmra.mrb[16].mxu1 %vm1380_vm6, %v1070_v43  ;;  %3657 = vmatmul.mubr.msk.bf16.vlgmr.msra.gmra.mrb[4].mxu0 %vm1380_vm6, %v1071_v44 }
 0x45a   : > { %3662 = vmatprep.mubr.msk.bf16.mxu1 %vm4095_vm0, %v4094_v0  ;;  %3668 = vmatprep.mubr.msk.bf16.mxu0 %vm4095_vm0, %v4094_v0 }
 0x524   : > { %v1421_v27 = vpop.f32.mrb[12].mxu1  ;;  %v1467_v45 = vpop.f32.mrb[0].mxu0 }
 0x525   : > { %v1565_v46 = vmul.f32 0.35355338, %v1421_v27  ;;  %v1566_v47 = vmul.f32 0.35355338, %v1467_v45  ;;  %v3640_v48 = vpop.f32.mrb[13].mxu1  ;;  %v3646_v49 = vpop.f32.mrb[1].mxu0 }
 0x526   : > { %v1424_v50 = vpop.f32.mrb[14].mxu1  ;;  %v1470_v51 = vpop.f32.mrb[2].mxu0 }
 0x527   : > { %v3641_v52 = vpop.f32.mrb[15].mxu1  ;;  %v3647_v53 = vpop.f32.mrb[3].mxu0  ;;  %v1572_v54 = vsel %vm1380_vm6, %v1566_v47, -inf  ;;  %v1569_v55 = vsel %vm1380_vm6, %v1565_v46, -inf }
 0x528   : > { %1573 = vmax.xlane.f32.xlu0 %v1572_v54  ;;  %1570 = vmax.xlane.f32.xlu1 %v1569_v55 }
 0x52c   : > { %v1513_v56 = vpop.f32.mrb[16].mxu1  ;;  %v1559_v57 = vpop.f32.mrb[4].mxu0 }
 0x52d   : > { %v1567_v58 = vmul.f32 0.35355338, %v1513_v56  ;;  %v1568_v59 = vmul.f32 0.35355338, %v1559_v57  ;;  %v3652_v60 = vpop.f32.mrb[17].mxu1  ;;  %v3658_v61 = vpop.f32.mrb[5].mxu0 }
 0x52e   : > { %v1516_v62 = vpop.f32.mrb[18].mxu1  ;;  %v1562_v63 = vpop.f32.mrb[6].mxu0 }
 0x52f   : > { %v3653_v1 = vpop.f32.mrb[19].mxu1  ;;  %v3659_v2 = vpop.f32.mrb[7].mxu0  ;;  %v1578_v3 = vsel %vm1380_vm6, %v1568_v59, -inf  ;;  %v1575_v4 = vsel %vm1380_vm6, %v1567_v58, -inf }
 0x530   : > { %1579 = vmax.xlane.f32.xlu1 %v1578_v3  ;;  %1576 = vmax.xlane.f32.xlu0 %v1575_v4 }
 0x541   : > { %1230 = vrot.lane.b32.xlu1 %v1223_v6, %s4103_s20 }
 0x546   : > { %1228 = vrot.lane.b32.xlu0 %v4381_v13, %s4103_s20 }
 0x5b5   : > { %v1571_v9 = vpop.xlane.xlu1 %1570  ;;  %v1574_v10 = vpop.xlane.xlu0 %1573 }
 0x5b6   : > { %v1581_v12 = vsub.f32 %v1565_v46, %v1571_v9  ;;  %v1582_v15 = vsub.f32 %v1566_v47, %v1574_v10 }
 0x5b8   : > { %v1585_v16 = vmul.f32 1.442695, %v1581_v12  ;;  %v1587_v17 = vmul.f32 1.442695, %v1582_v15 }
 0x5ba   : > { %3897 = vpow2.f32 %v1585_v16 }
 0x5bb   : > { %3899 = vpow2.f32 %v1587_v17 }
 0x5bd   : > { %v1577_v26 = vpop.xlane.xlu0 %1576  ;;  %v1580_v21 = vpop.xlane.xlu1 %1579 }
 0x5be   : > { %v1583_v28 = vsub.f32 %v1567_v58, %v1577_v26  ;;  %v1584_v22 = vsub.f32 %v1568_v59, %v1580_v21 }
 0x5c0   : > { %v1589_v29 = vmul.f32 1.442695, %v1583_v28  ;;  %v1591_v23 = vmul.f32 1.442695, %v1584_v22 }
 0x5c1   : > { %v1229_v33 = vpop.permute.xlu0 %1228  ;;  %v1231_v34 = vpop.permute.xlu1 %1230 }
 0x5c2   : > { %3901 = vpow2.f32 %v1589_v29 }
 0x5c3   : > { %3903 = vpow2.f32 %v1591_v23 }
 0x5c4   : > { %v4538_v18 = vpop.eup %3897 }
 0x5c5   : > { %v4540_v19 = vpop.eup %3899  ;;  %v1593_v20 = vsel %vm1380_vm6, %v4538_v18, 0.0 }
 0x5c6   : > { %1594 = vadd.xlane.f32.xlu0 %v1593_v20  ;;  %v1596_v13 = vsel %vm1380_vm6, %v4540_v19, 0.0 }
 0x5c7   : > { %1597 = vadd.xlane.f32.xlu1 %v1596_v13 }
 0x5cc   : > { %v4548_v30 = vpop.eup %3901 }
 0x5cd   : > { %v4550_v31 = vpop.eup %3903  ;;  %v1599_v32 = vsel %vm1380_vm6, %v4548_v30, 0.0 }
 0x5ce   : > { %v1602_v24 = vsel %vm1380_vm6, %v4550_v31, 0.0 }
 0x5d8   : > { %1234 = vrot.lane.b32.xlu1 %v1227_v8, %s4103_s20 }
 0x5dc   : > { %1232 = vrot.lane.b32.xlu0 %v1225_v7, %s4103_s20 }
 0x5fb   : > { %1600 = vadd.xlane.f32.xlu0 %v1599_v32 }
 0x5fc   : > { %1603 = vadd.xlane.f32.xlu1 %v1602_v24 }
 0x653   : > { %v1595_v11 = vpop.xlane.xlu0 %1594 }
 0x654   : > { %v1598_v35 = vpop.xlane.xlu1 %1597  ;;  %3905 = vrcp.f32 %v1595_v11 }
 0x655   : > { %3907 = vrcp.f32 %v1598_v35 }
 0x657   : > { %v1233_v36 = vpop.permute.xlu0 %1232 }
 0x658   : > { %v1235_v37 = vpop.permute.xlu1 %1234  ;;  %v1240_v38 = vcombine.low %v1229_v33, %v1233_v36  ;;  %v1241_v39 = vcombine.high %v1229_v33, %v1233_v36 }
 0x659   : > { %v1256_v40 = vcombine.low %v1231_v34, %v1235_v37  ;;  %v1257_v41 = vcombine.high %v1231_v34, %v1235_v37 }
 0x65a   : > { %v1248_v42 = vrot.slane %v1240_v38, %v4472_v14  ;;  %v1255_v43 = vrot.slane %v1241_v39, %v4472_v14 }
 0x65b   : > { %v1264_v44 = vrot.slane %v1256_v40, %v4472_v14  ;;  %v1271_v27 = vrot.slane %v1257_v41, %v4472_v14 }
 0x65d   : > { %v1272_v45 = vcombine.low %v1248_v42, %v1264_v44  ;;  %v1273_v46 = vcombine.high %v1248_v42, %v1264_v44  ;;  %v1288_v47 = vcombine.low %v1255_v43, %v1271_v27  ;;  %v1289_v48 = vcombine.high %v1255_v43, %v1271_v27 }
 0x65e   : > { %v3906_v4 = vpop.eup %3905 }
 0x65f   : > { %v1280_v49 = vrot.slane %v1272_v45, %v4475_v25  ;;  %v1287_v50 = vrot.slane %v1273_v46, %v4475_v25  ;;  %v1296_v51 = vrot.slane %v1288_v47, %v4475_v25  ;;  %v1303_v52 = vrot.slane %v1289_v48, %v4475_v25  ;;  %v3908_v8 = vpop.eup %3907 }
 0x660   : > { %v1610_v16 = vmul.f32 %v3908_v8, %v4540_v19  ;;  %v1609_v17 = vmul.f32 %v3906_v4, %v4538_v18 }
 0x661   : > { %v1308_v53 = vcombine.low %v1280_v49, %v1287_v50  ;;  %v3494_v54 = vcombine.high %v1280_v49, %v1287_v50  ;;  %v1324_v55 = vcombine.low %v1296_v51, %v1303_v52  ;;  %v3495_v56 = vcombine.high %v1296_v51, %v1303_v52 }
 0x662   : > { %v1613_v29 = vpack.c.bf16 %v1609_v17, %v1609_v17  ;;  %v1614_v23 = vpack.c.bf16 %v1610_v16, %v1610_v16 }
 0x663   : > { %v1315_v57 = vrot.slane %v1308_v53, %v4472_v14  ;;  %v1323_v58 = vrot.slane %v3494_v54, %v4472_v14  ;;  %v1331_v59 = vrot.slane %v1324_v55, %v4472_v14  ;;  %v1339_v60 = vrot.slane %v3495_v56, %v4472_v14 }
 0x665   : > { %v1340_v61 = vcombine.low %v1315_v57, %v1323_v58  ;;  %v1341_v62 = vcombine.high %v1315_v57, %v1323_v58  ;;  %v1356_v63 = vcombine.low %v1331_v59, %v1339_v60  ;;  %v1357_v1 = vcombine.high %v1331_v59, %v1339_v60 }
 0x667   : > { %v1348_v2 = vrot.slane %v1340_v61, %v4475_v25  ;;  %v1355_v3 = vrot.slane %v1341_v62, %v4475_v25  ;;  %v1364_v6 = vrot.slane %v1356_v63, %v4475_v25  ;;  %v1371_v7 = vrot.slane %v1357_v1, %v4475_v25  ;;  %v3863_v63 = vld [vmem:[%s4927_s5] sm:$0xff]  }
 0x669   : > { %v1372_v9 = vcombine.low %v1348_v2, %v1364_v6  ;;  %v1373_v10 = vcombine.high %v1348_v2, %v1364_v6  ;;  %v1374_v12 = vcombine.low %v1355_v3, %v1371_v7  ;;  %v1375_v15 = vcombine.high %v1355_v3, %v1371_v7 }
 0x66b   : > { %v1376_v20 = vpack.c.bf16 %v1372_v9, %v1372_v9  ;;  %v1377_v13 = vpack.c.bf16 %v1373_v10, %v1373_v10  ;;  %v1378_v28 = vpack.c.bf16 %v1374_v12, %v1374_v12  ;;  %v1379_v22 = vpack.c.bf16 %v1375_v15, %v1375_v15  ;;  %v3864_v10 = vld [vmem:[%s4927_s5 + $0x8] sm:$0xff]  }
 0x66d   : > { %v1622_v26 = vsel %vm1620_vm7, %v1376_v20, 0  ;;  %v1668_v21 = vsel %vm1620_vm7, %v1377_v13, 0  ;;  %v1714_v18 = vsel %vm1620_vm7, %v1378_v28, 0  ;;  %v1760_v19 = vsel %vm1620_vm7, %v1379_v22, 0 }
 0x66e   : > { %3661 = vmatpush3.bf16.msra.mxu1 %v1622_v26  ;;  %3667 = vmatpush3.bf16.msra.mxu0 %v1668_v21 }
 0x66f   : > { %3672 = vmatprep.subr.bf16.mxu1 %v4094_v0  ;;  %3678 = vmatprep.subr.bf16.mxu0 %v4094_v0 }
 0x671   : > { %3663 = vmatmul.mubr.msk.bf16.vlgmr.msra.gmra.mrb[20].mxu1 %vm1380_vm6, %v1613_v29  ;;  %3669 = vmatmul.mubr.msk.bf16.vlgmr.msra.gmra.mrb[8].mxu0 %vm1380_vm6, %v1614_v23 }
 0x672   : > { %3673 = vmatpush3.bf16.msra.mxu1 %v1714_v18  ;;  %3679 = vmatpush3.bf16.msra.mxu0 %v1760_v19 }
 0x673   : > { %3674 = vmatprep.mubr.msk.bf16.mxu1 %vm4095_vm0, %v4094_v0  ;;  %3680 = vmatprep.mubr.msk.bf16.mxu0 %vm4095_vm0, %v4094_v0 }
 0x674   : > { %3684 = vmatprep.subr.bf16.mxu1 %v4094_v0  ;;  %3692 = vmatprep.subr.bf16.mxu0 %v4094_v0 }
 0x688   : > { %v1601_v32 = vpop.xlane.xlu0 %1600 }
 0x689   : > { %v1604_v24 = vpop.xlane.xlu1 %1603  ;;  %3909 = vrcp.f32 %v1601_v32 }
 0x68a   : > { %3911 = vrcp.f32 %v1604_v24 }
 0x693   : > { %v3910_v33 = vpop.eup %3909 }
 0x694   : > { %v3912_v34 = vpop.eup %3911  ;;  %v1611_v11 = vmul.f32 %v3910_v33, %v4548_v30 }
 0x695   : > { %v1612_v35 = vmul.f32 %v3912_v34, %v4550_v31 }
 0x696   : > { %v1615_v36 = vpack.c.bf16 %v1611_v11, %v1611_v11 }
 0x697   : > { %v1616_v37 = vpack.c.bf16 %v1612_v35, %v1612_v35 }
 0x698   : > { %3675 = vmatmul.mubr.msk.bf16.vlgmr.msra.gmra.mrb[24].mxu1 %vm1380_vm6, %v1615_v36 }
 0x699   : > { %3681 = vmatmul.mubr.msk.bf16.vlgmr.msra.gmra.mrb[12].mxu0 %vm1380_vm6, %v1616_v37  ;;  %3688 = vmatprep.mubr.msk.bf16.mxu1 %vm4095_vm0, %v4094_v0 }
 0x69a   : > { %3694 = vmatprep.mubr.msk.bf16.mxu0 %vm4095_vm0, %v4094_v0  ;;  %3685 = vmatpush3.bf16.msra.mxu1 %v3863_v63 }
 0x69b   : > { %3686 = vmatprep.subr.bf16.mxu1 %v4094_v0 }
 0x69e   : > { %3687 = vmatpush3.bf16.msra.mxu1 %v3864_v10 }
 0x69f   : > { %3698 = vmatprep.subr.bf16.mxu1 %v4094_v0 }
 0x744   : > { %v1658_v38 = vpop.f32.mrb[20].mxu1  ;;  %v1704_v39 = vpop.f32.mrb[8].mxu0 }
 0x745   : > { %v3664_v40 = vpop.f32.mrb[21].mxu1  ;;  %v3670_v41 = vpop.f32.mrb[9].mxu0 }
 0x746   : > { %v1661_v42 = vpop.f32.mrb[22].mxu1  ;;  %v1707_v30 = vpop.f32.mrb[10].mxu0 }
 0x747   : > { %v3665_v43 = vpop.f32.mrb[23].mxu1  ;;  %v3671_v31 = vpop.f32.mrb[11].mxu0 }
 0x76b   : > { %v1750_v44 = vpop.f32.mrb[24].mxu1 }
 0x76c   : > { %v1802_v27 = vcombine.low %v1658_v38, %v1750_v44  ;;  %v1803_v45 = vcombine.high %v1658_v38, %v1750_v44  ;;  %v1796_v46 = vpop.f32.mrb[12].mxu0  ;;  %v3676_v47 = vpop.f32.mrb[25].mxu1 }
 0x76d   : > { %v1818_v48 = vcombine.low %v1704_v39, %v1796_v46  ;;  %v1819_v49 = vcombine.high %v1704_v39, %v1796_v46  ;;  %v3682_v50 = vpop.f32.mrb[13].mxu0  ;;  %v1753_v51 = vpop.f32.mrb[26].mxu1  ;;  %v3506_v39 = vld [vmem:[%s4928_s6] ss:$0 sm:$0xff] }
 0x76e   : > { %v1810_v52 = vrot.slane %v1802_v27, %v4472_v14  ;;  %v1817_v53 = vrot.slane %v1803_v45, %v4472_v14  ;;  %v1799_v54 = vpop.f32.mrb[14].mxu0  ;;  %v3677_v55 = vpop.f32.mrb[27].mxu1 }
 0x76f   : > { %v1826_v56 = vrot.slane %v1818_v48, %v4472_v14  ;;  %v1833_v57 = vrot.slane %v1819_v49, %v4472_v14  ;;  %v3683_v58 = vpop.f32.mrb[15].mxu0 }
 0x771   : > { %v1834_v59 = vcombine.low %v1810_v52, %v1826_v56  ;;  %v1835_v60 = vcombine.high %v1810_v52, %v1826_v56  ;;  %v1850_v61 = vcombine.low %v1817_v53, %v1833_v57  ;;  %v1851_v62 = vcombine.high %v1817_v53, %v1833_v57 }
 0x773   : > { %v1842_v1 = vrot.slane %v1834_v59, %v4475_v25  ;;  %v1849_v2 = vrot.slane %v1835_v60, %v4475_v25  ;;  %v1858_v3 = vrot.slane %v1850_v61, %v4475_v25  ;;  %v1865_v4 = vrot.slane %v1851_v62, %v4475_v25 }
 0x775   : > { %v1870_v6 = vcombine.low %v1842_v1, %v1849_v2  ;;  %v3504_v7 = vcombine.high %v1842_v1, %v1849_v2  ;;  %v1886_v8 = vcombine.low %v1858_v3, %v1865_v4  ;;  %v3505_v9 = vcombine.high %v1858_v3, %v1865_v4 }
 0x777   : > { %v1877_v12 = vrot.slane %v1870_v6, %v4472_v14  ;;  %v1885_v15 = vrot.slane %v3504_v7, %v4472_v14  ;;  %v1893_v16 = vrot.slane %v1886_v8, %v4472_v14  ;;  %v1901_v17 = vrot.slane %v3505_v9, %v4472_v14 }
 0x779   : > { %v1903_v20 = vcombine.high %v1877_v12, %v1885_v15  ;;  %v1919_v13 = vcombine.high %v1893_v16, %v1901_v17  ;;  %v1902_v26 = vcombine.low %v1877_v12, %v1885_v15  ;;  %v1918_v21 = vcombine.low %v1893_v16, %v1901_v17 }
 0x77b   : > { %v1917_v28 = vrot.slane %v1903_v20, %v4475_v25  ;;  %v1933_v22 = vrot.slane %v1919_v13, %v4475_v25  ;;  %v1910_v29 = vrot.slane %v1902_v26, %v4475_v25  ;;  %v1926_v23 = vrot.slane %v1918_v21, %v4475_v25 }
 0x77d   : > { %v1936_v18 = vcombine.low %v1917_v28, %v1933_v22  ;;  %v1935_v19 = vcombine.high %v1910_v29, %v1926_v23  ;;  %v1937_v32 = vcombine.high %v1917_v28, %v1933_v22  ;;  %v1934_v24 = vcombine.low %v1910_v29, %v1926_v23 }
 0x77f   : > { %1943 = vrot.lane.b32.xlu1 %v1936_v18, %s4104_s30  ;;  %1939 = vrot.lane.b32.xlu0 %v1935_v19, %s4105_s23 }
 0x783   : > { %1947 = vrot.lane.b32.xlu0 %v1937_v32, %s4106_s15 }
 0x7f1   : > { %v1940_v33 = vpop.permute.xlu0 %1939  ;;  %v1944_v34 = vpop.permute.xlu1 %1943 }
 0x7f2   : > { %v1950_v11 = vsel %vm1380_vm6, %v1934_v24, %v1940_v33 }
 0x7f3   : > { %v1952_v36 = vsel %vm1951_vm8, %v1950_v11, %v1944_v34 }
 0x7f5   : > { %v1948_v35 = vpop.permute.xlu0 %1947 }
 0x7f6   : > { %v1954_v37 = vsel %vm1953_vm9, %v1952_v36, %v1948_v35 }
 0x7f7   : > { %v1959_v38 = vpack.c.bf16 %v1954_v37, %v1954_v37 }
 0x7f9   : > { %3689 = vmatmul.mubr.msk.bf16.vlgmr.msra.gmra.mrb[28].mxu1 %vm610_vm1, %v1959_v38 }
 0x7fa   : > { %3700 = vmatprep.mubr.msk.bf16.mxu1 %vm4095_vm0, %v4094_v0 }
 0x8cc   : > { %v2016_v40 = vpop.f32.mrb[28].mxu1 }
 0x8cd   : > { %v4632_v41 = vadd.f32 %v3506_v39, %v2016_v40  ;;  %v3690_v42 = vpop.f32.mrb[29].mxu1 }
 0x8ce   : > { %v2019_v30 = vpop.f32.mrb[30].mxu1 }
 0x8cf   : > { %2026 = vrot.lane.b32.xlu0 %v4632_v41, %s4098_s29  ;;  %2023 = vrot.lane.b32.xlu1 %v4632_v41, %s4099_s1  ;;  %v3691_v43 = vpop.f32.mrb[31].mxu1  ;;  %s4981_s29 = sld [smem:[#allocation17_spill]] }
 0x8d3   : > { %2172 = vrot.lane.b32.xlu0 %v4632_v41, %s4096_s21  ;;  %2029 = vrot.lane.b32.xlu1 %v4632_v41, %s4100_s27 }
 0x8d5   : > { %p4986_p10 = scmp.ne.s32.totalorder %s4981_s29, 0 }
 0x941   : > { %v4642_v31 = vpop.permute.xlu0 %2026  ;;  %v4644_v44 = vpop.permute.xlu1 %2023 }
 0x942   : > { %2176 = vrot.lane.b32.xlu0 %v4642_v31, %s4096_s21  ;;  %2174 = vrot.lane.b32.xlu1 %v4644_v44, %s4096_s21  ;;  %v2032_v47 = vcombine.low %v4632_v41, %v4642_v31  ;;  %v2033_v48 = vcombine.high %v4632_v41, %v4642_v31 }
 0x944   : > { %v2040_v52 = vrot.slane %v2032_v47, %v4472_v14  ;;  %v2047_v53 = vrot.slane %v2033_v48, %v4472_v14 }
 0x945   : > { %v4650_v27 = vpop.permute.xlu1 %2029  ;;  %v2173_v49 = vpop.permute.xlu0 %2172 }
 0x946   : > { %2178 = vrot.lane.b32.xlu1 %v4650_v27, %s4096_s21  ;;  %v2048_v45 = vcombine.low %v4644_v44, %v4650_v27  ;;  %v2049_v46 = vcombine.high %v4644_v44, %v4650_v27  ;;  %s575_s21 = sand.u32 1, %s4081_s25  }
 0x947   : > { %s3478_s18 = sshll.u32 %s575_s21, 3  ;;  %s3365_s1 = scalar_lea.sflag [#allocation4], %s575_s21 }
 0x948   : > { %v2056_v50 = vrot.slane %v2048_v45, %v4472_v14  ;;  %v2063_v51 = vrot.slane %v2049_v46, %v4472_v14 }
 0x94a   : > { %v2064_v56 = vcombine.low %v2040_v52, %v2056_v50  ;;  %v2065_v57 = vcombine.high %v2040_v52, %v2056_v50  ;;  %v2080_v58 = vcombine.low %v2047_v53, %v2063_v51  ;;  %v2081_v59 = vcombine.high %v2047_v53, %v2063_v51 }
 0x94c   : > { %v2072_v2 = vrot.slane %v2064_v56, %v4475_v25  ;;  %v2079_v3 = vrot.slane %v2065_v57, %v4475_v25  ;;  %v2088_v4 = vrot.slane %v2080_v58, %v4475_v25  ;;  %v2095_v6 = vrot.slane %v2081_v59, %v4475_v25 }
 0x94e   : > { %v2100_v20 = vcombine.low %v2072_v2, %v2079_v3  ;;  %v3510_v13 = vcombine.high %v2072_v2, %v2079_v3  ;;  %v2116_v26 = vcombine.low %v2088_v4, %v2095_v6  ;;  %v3511_v21 = vcombine.high %v2088_v4, %v2095_v6 }
 0x950   : > { %v2107_v33 = vrot.slane %v2100_v20, %v4472_v14  ;;  %v2115_v34 = vrot.slane %v3510_v13, %v4472_v14  ;;  %v2123_v11 = vrot.slane %v2116_v26, %v4472_v14  ;;  %v2131_v35 = vrot.slane %v3511_v21, %v4472_v14 }
 0x952   : > { %v2132_v47 = vcombine.low %v2107_v33, %v2115_v34  ;;  %v2148_v48 = vcombine.low %v2123_v11, %v2131_v35 }
 0x954   : > { %v2156_v56 = vrot.slane %v2148_v48, %v4475_v25 }
 0x9b4   : > { %v2177_v54 = vpop.permute.xlu0 %2176  ;;  %v2175_v55 = vpop.permute.xlu1 %2174 }
 0x9b5   : > { %v2184_v60 = vcombine.low %v2173_v49, %v2177_v54  ;;  %v2185_v61 = vcombine.high %v2173_v49, %v2177_v54 }
 0x9b7   : > { %v2192_v7 = vrot.slane %v2184_v60, %v4472_v14  ;;  %v2199_v8 = vrot.slane %v2185_v61, %v4472_v14  ;;  %v2133_v61 = vcombine.high %v2107_v33, %v2115_v34 }
 0x9b8   : > { %v2179_v62 = vpop.permute.xlu1 %2178 }
 0x9b9   : > { %v2200_v63 = vcombine.low %v2175_v55, %v2179_v62  ;;  %v2201_v1 = vcombine.high %v2175_v55, %v2179_v62  ;;  %v2140_v55 = vrot.slane %v2132_v47, %v4475_v25 }
 0x9bb   : > { %v2208_v9 = vrot.slane %v2200_v63, %v4472_v14  ;;  %v2215_v10 = vrot.slane %v2201_v1, %v4472_v14  ;;  %v2164_v62 = vcombine.low %v2140_v55, %v2156_v56  ;;  %v2165_v63 = vcombine.high %v2140_v55, %v2156_v56 }
 0x9bc   : > { %v2149_v1 = vcombine.high %v2123_v11, %v2131_v35 }
 0x9bd   : > { %v2216_v12 = vcombine.low %v2192_v7, %v2208_v9  ;;  %v2217_v15 = vcombine.high %v2192_v7, %v2208_v9  ;;  %v2232_v16 = vcombine.low %v2199_v8, %v2215_v10  ;;  %v2233_v17 = vcombine.high %v2199_v8, %v2215_v10 }
 0x9be   : > { %v2168_v4 = vpack.c.bf16 %v2164_v62, %v2164_v62  ;;  %v2169_v6 = vpack.c.bf16 %v2165_v63, %v2165_v63  ;;  %v2147_v7 = vrot.slane %v2133_v61, %v4475_v25  ;;  %v2163_v8 = vrot.slane %v2149_v1, %v4475_v25 }
 0x9bf   : > { %v2224_v28 = vrot.slane %v2216_v12, %v4475_v25  ;;  %v2231_v22 = vrot.slane %v2217_v15, %v4475_v25  ;;  %v2240_v29 = vrot.slane %v2232_v16, %v4475_v25  ;;  %v2247_v23 = vrot.slane %v2233_v17, %v4475_v25 }
 0x9c0   : > { %v2166_v12 = vcombine.low %v2147_v7, %v2163_v8  ;;  %v2167_v15 = vcombine.high %v2147_v7, %v2163_v8 }
 0x9c1   : > { %v2252_v18 = vcombine.low %v2224_v28, %v2231_v22  ;;  %v3512_v19 = vcombine.high %v2224_v28, %v2231_v22  ;;  %v2268_v32 = vcombine.low %v2240_v29, %v2247_v23  ;;  %v3513_v24 = vcombine.high %v2240_v29, %v2247_v23 }
 0x9c2   : > { %v2170_v16 = vpack.c.bf16 %v2166_v12, %v2166_v12  ;;  %v2171_v17 = vpack.c.bf16 %v2167_v15, %v2167_v15 }
 0x9c3   : > { %v2259_v36 = vrot.slane %v2252_v18, %v4472_v14  ;;  %v2267_v37 = vrot.slane %v3512_v19, %v4472_v14  ;;  %v2275_v38 = vrot.slane %v2268_v32, %v4472_v14  ;;  %v2283_v39 = vrot.slane %v3513_v24, %v4472_v14 }
 0x9c5   : > { %v2284_v40 = vcombine.low %v2259_v36, %v2267_v37  ;;  %v2300_v42 = vcombine.low %v2275_v38, %v2283_v39  ;;  %v2285_v30 = vcombine.high %v2259_v36, %v2267_v37  ;;  %v2301_v43 = vcombine.high %v2275_v38, %v2283_v39 }
 0x9c7   : > { %v2292_v45 = vrot.slane %v2284_v40, %v4475_v25  ;;  %v2308_v46 = vrot.slane %v2300_v42, %v4475_v25  ;;  %v2299_v51 = vrot.slane %v2285_v30, %v4475_v25  ;;  %v2315_v52 = vrot.slane %v2301_v43, %v4475_v25 }
 0x9c9   : > { %v2316_v49 = vcombine.low %v2292_v45, %v2308_v46  ;;  %v2317_v50 = vcombine.high %v2292_v45, %v2308_v46  ;;  %v2318_v59 = vcombine.low %v2299_v51, %v2315_v52  ;;  %v2319_v60 = vcombine.high %v2299_v51, %v2315_v52 }
 0x9cb   : > { %v2320_v53 = vpack.c.bf16 %v2316_v49, %v2316_v49  ;;  %v2321_v54 = vpack.c.bf16 %v2317_v50, %v2317_v50  ;;  %v2322_v2 = vpack.c.bf16 %v2318_v59, %v2318_v59  ;;  %v2323_v3 = vpack.c.bf16 %v2319_v60, %v2319_v60 }
 0x9cd   : > { %v2480_v57 = vsel %vm1380_vm6, %v2320_v53, 0  ;;  %v2526_v58 = vsel %vm1380_vm6, %v2321_v54, 0  ;;  %v2572_v9 = vsel %vm1380_vm6, %v2322_v2, 0  ;;  %v2618_v10 = vsel %vm1380_vm6, %v2323_v3, 0 }
 0x9ce   : > { %3693 = vmatpush3.bf16.xpose.msra.mxu0 %v2480_v57  ;;  %3699 = vmatpush3.bf16.xpose.msra.mxu1 %v2526_v58 }
 0x9cf   : > { %3704 = vmatprep.subr.bf16.mxu0 %v4094_v0  ;;  %3710 = vmatprep.subr.bf16.mxu1 %v4094_v0 }
 0x9d5   : > { %3695 = vmatmul.mubr.msk.bf16.vlgmr.msra.gmra.mrb[16].mxu0 %vm1380_vm6, %v2168_v4  ;;  %3701 = vmatmul.mubr.msk.bf16.vlgmr.msra.gmra.mrb[32].mxu1 %vm1380_vm6, %v2169_v6 }
 0x9d6   : > { %3705 = vmatpush3.bf16.xpose.msra.mxu0 %v2572_v9  ;;  %3711 = vmatpush3.bf16.xpose.msra.mxu1 %v2618_v10 }
 0x9d7   : > { %3706 = vmatprep.mubr.msk.bf16.mxu0 %vm4095_vm0, %v4094_v0  ;;  %3712 = vmatprep.mubr.msk.bf16.mxu1 %vm4095_vm0, %v4094_v0 }
 0x9d8   : > { %3716 = vmatprep.subr.bf16.mxu0 %v4094_v0  ;;  %3722 = vmatprep.subr.bf16.mxu1 %v4094_v0 }
 0x9dd   : > { %3707 = vmatmul.mubr.msk.bf16.vlgmr.msra.gmra.mrb[20].mxu0 %vm1380_vm6, %v2170_v16  ;;  %3713 = vmatmul.mubr.msk.bf16.vlgmr.msra.gmra.mrb[36].mxu1 %vm1380_vm6, %v2171_v17 }
 0x9de   : > { %3718 = vmatprep.mubr.msk.bf16.mxu0 %vm4095_vm0, %v4094_v0  ;;  %3724 = vmatprep.mubr.msk.bf16.mxu1 %vm4095_vm0, %v4094_v0 }
 0xaa8   : > { %v2516_v20 = vpop.f32.mrb[16].mxu0  ;;  %v2562_v13 = vpop.f32.mrb[32].mxu1 }
 0xaa9   : > { %v2660_v26 = vmul.f32 0.35355338, %v2516_v20  ;;  %v2661_v21 = vmul.f32 0.35355338, %v2562_v13  ;;  %v3696_v28 = vpop.f32.mrb[17].mxu0  ;;  %v3702_v22 = vpop.f32.mrb[33].mxu1 }
 0xaaa   : > { %v2519_v29 = vpop.f32.mrb[18].mxu0  ;;  %v2565_v23 = vpop.f32.mrb[34].mxu1 }
 0xaab   : > { %v3697_v18 = vpop.f32.mrb[19].mxu0  ;;  %v3703_v19 = vpop.f32.mrb[35].mxu1  ;;  %v2664_v32 = vsel %vm1380_vm6, %v2660_v26, -inf  ;;  %v2667_v24 = vsel %vm1380_vm6, %v2661_v21, -inf }
 0xaac   : > { %2665 = vmax.xlane.f32.xlu0 %v2664_v32  ;;  %2668 = vmax.xlane.f32.xlu1 %v2667_v24 }
 0xab0   : > { %v2608_v33 = vpop.f32.mrb[20].mxu0  ;;  %v2654_v34 = vpop.f32.mrb[36].mxu1 }
 0xab1   : > { %v2662_v11 = vmul.f32 0.35355338, %v2608_v33  ;;  %v3708_v35 = vpop.f32.mrb[21].mxu0  ;;  %v3714_v36 = vpop.f32.mrb[37].mxu1  ;;  %v2663_v39 = vmul.f32 0.35355338, %v2654_v34 }
 0xab2   : > { %v2611_v37 = vpop.f32.mrb[22].mxu0  ;;  %v2657_v38 = vpop.f32.mrb[38].mxu1 }
 0xab3   : > { %v3709_v40 = vpop.f32.mrb[23].mxu0  ;;  %v3715_v42 = vpop.f32.mrb[39].mxu1  ;;  %v2670_v30 = vsel %vm1380_vm6, %v2662_v11, -inf  ;;  %v2673_v43 = vsel %vm1380_vm6, %v2663_v39, -inf }
 0xab4   : > { %2671 = vmax.xlane.f32.xlu0 %v2670_v30 }
 0xab8   : > { %2674 = vmax.xlane.f32.xlu0 %v2673_v43 }
 0xabd   : > { %2324 = vrot.lane.b32.xlu1 %v4632_v41, %s4103_s20 }
 0xb39   : > { %v2666_v45 = vpop.xlane.xlu0 %2665  ;;  %v2669_v46 = vpop.xlane.xlu1 %2668 }
 0xb3a   : > { %v2676_v47 = vsub.f32 %v2660_v26, %v2666_v45  ;;  %v2677_v48 = vsub.f32 %v2661_v21, %v2669_v46 }
 0xb3c   : > { %v2680_v49 = vmul.f32 1.442695, %v2676_v47  ;;  %v2682_v50 = vmul.f32 1.442695, %v2677_v48 }
 0xb3e   : > { %3913 = vpow2.f32 %v2680_v49 }
 0xb3f   : > { %3915 = vpow2.f32 %v2682_v50 }
 0xb41   : > { %v2672_v41 = vpop.xlane.xlu0 %2671 }
 0xb42   : > { %v2678_v55 = vsub.f32 %v2662_v11, %v2672_v41 }
 0xb44   : > { %v2684_v58 = vmul.f32 1.442695, %v2678_v55 }
 0xb45   : > { %v2675_v56 = vpop.xlane.xlu0 %2674 }
 0xb46   : > { %v2679_v57 = vsub.f32 %v2663_v39, %v2675_v56  ;;  %3917 = vpow2.f32 %v2684_v58 }
 0xb48   : > { %v4720_v51 = vpop.eup %3913  ;;  %v2686_v59 = vmul.f32 1.442695, %v2679_v57 }
 0xb49   : > { %v4722_v52 = vpop.eup %3915  ;;  %v2688_v53 = vsel %vm1380_vm6, %v4720_v51, 0.0 }
 0xb4a   : > { %2689 = vadd.xlane.f32.xlu1 %v2688_v53  ;;  %v2691_v54 = vsel %vm1380_vm6, %v4722_v52, 0.0  ;;  %3919 = vpow2.f32 %v2686_v59 }
 0xb4b   : > { %2692 = vadd.xlane.f32.xlu0 %v2691_v54 }
 0xb50   : > { %v4734_v60 = vpop.eup %3917 }
 0xb54   : > { %v4736_v61 = vpop.eup %3919 }
 0xb5b   : > { %2328 = vrot.lane.b32.xlu1 %v4642_v31, %s4103_s20  ;;  %v2694_v31 = vsel %vm1380_vm6, %v4734_v60, 0.0 }
 0xb5f   : > { %2330 = vrot.lane.b32.xlu1 %v4650_v27, %s4103_s20  ;;  %v2697_v27 = vsel %vm1380_vm6, %v4736_v61, 0.0 }
 0xb61   : > { %2326 = vrot.lane.b32.xlu0 %v4644_v44, %s4103_s20  ;;  %v2325_v44 = vpop.permute.xlu1 %2324  ;;  %s4982_s20 = sld [smem:[#allocation23_spill]] }
 0xb80   : > { %2695 = vadd.xlane.f32.xlu0 %v2694_v31 }
 0xb83   : > { %2698 = vadd.xlane.f32.xlu1 %v2697_v27 }
 0xbd7   : > { %v2690_v62 = vpop.xlane.xlu1 %2689 }
 0xbd8   : > { %v2693_v63 = vpop.xlane.xlu0 %2692  ;;  %3921 = vrcp.f32 %v2690_v62 }
 0xbd9   : > { %3923 = vrcp.f32 %v2693_v63 }
 0xbdb   : > { %v2329_v1 = vpop.permute.xlu1 %2328 }
 0xbdc   : > { %v2336_v2 = vcombine.low %v2325_v44, %v2329_v1  ;;  %v2337_v3 = vcombine.high %v2325_v44, %v2329_v1  ;;  %v2327_v4 = vpop.permute.xlu0 %2326 }
 0xbde   : > { %v2344_v9 = vrot.slane %v2336_v2, %v4472_v14  ;;  %v2351_v10 = vrot.slane %v2337_v3, %v4472_v14 }
 0xbdf   : > { %v2331_v6 = vpop.permute.xlu1 %2330 }
 0xbe0   : > { %v2352_v7 = vcombine.low %v2327_v4, %v2331_v6  ;;  %v2353_v8 = vcombine.high %v2327_v4, %v2331_v6 }
 0xbe2   : > { %v2360_v12 = vrot.slane %v2352_v7, %v4472_v14  ;;  %v2367_v15 = vrot.slane %v2353_v8, %v4472_v14  ;;  %v3922_v40 = vpop.eup %3921 }
 0xbe3   : > { %v3924_v43 = vpop.eup %3923  ;;  %v2704_v49 = vmul.f32 %v3922_v40, %v4720_v51 }
 0xbe4   : > { %v2368_v16 = vcombine.low %v2344_v9, %v2360_v12  ;;  %v2369_v17 = vcombine.high %v2344_v9, %v2360_v12  ;;  %v2384_v20 = vcombine.low %v2351_v10, %v2367_v15  ;;  %v2385_v13 = vcombine.high %v2351_v10, %v2367_v15 }
 0xbe5   : > { %v2705_v50 = vmul.f32 %v3924_v43, %v4722_v52  ;;  %v2708_v58 = vpack.c.bf16 %v2704_v49, %v2704_v49 }
 0xbe6   : > { %v2376_v26 = vrot.slane %v2368_v16, %v4475_v25  ;;  %v2383_v21 = vrot.slane %v2369_v17, %v4475_v25  ;;  %v2392_v28 = vrot.slane %v2384_v20, %v4475_v25  ;;  %v2399_v22 = vrot.slane %v2385_v13, %v4475_v25 }
 0xbe7   : > { %v2709_v59 = vpack.c.bf16 %v2705_v50, %v2705_v50 }
 0xbe8   : > { %v2404_v29 = vcombine.low %v2376_v26, %v2383_v21  ;;  %v3514_v23 = vcombine.high %v2376_v26, %v2383_v21  ;;  %v2420_v18 = vcombine.low %v2392_v28, %v2399_v22  ;;  %v3515_v19 = vcombine.high %v2392_v28, %v2399_v22 }
 0xbea   : > { %v2411_v32 = vrot.slane %v2404_v29, %v4472_v14  ;;  %v2419_v24 = vrot.slane %v3514_v23, %v4472_v14  ;;  %v2427_v33 = vrot.slane %v2420_v18, %v4472_v14  ;;  %v2435_v34 = vrot.slane %v3515_v19, %v4472_v14 }
 0xbec   : > { %v2436_v11 = vcombine.low %v2411_v32, %v2419_v24  ;;  %v2437_v35 = vcombine.high %v2411_v32, %v2419_v24  ;;  %v2452_v36 = vcombine.low %v2427_v33, %v2435_v34  ;;  %v2453_v37 = vcombine.high %v2427_v33, %v2435_v34 }
 0xbee   : > { %v2444_v38 = vrot.slane %v2436_v11, %v4475_v25  ;;  %v2451_v39 = vrot.slane %v2437_v35, %v4475_v25  ;;  %v2460_v42 = vrot.slane %v2452_v36, %v4475_v25  ;;  %v2467_v30 = vrot.slane %v2453_v37, %v4475_v25  ;;  %v3865_v36 = vld [vmem:[%s4929_s7] sm:$0xff]  }
 0xbf0   : > { %v2468_v45 = vcombine.low %v2444_v38, %v2460_v42  ;;  %v2469_v46 = vcombine.high %v2444_v38, %v2460_v42  ;;  %v2470_v47 = vcombine.low %v2451_v39, %v2467_v30  ;;  %v2471_v48 = vcombine.high %v2451_v39, %v2467_v30 }
 0xbf2   : > { %v2472_v53 = vpack.c.bf16 %v2468_v45, %v2468_v45  ;;  %v2473_v54 = vpack.c.bf16 %v2469_v46, %v2469_v46  ;;  %v2474_v56 = vpack.c.bf16 %v2470_v47, %v2470_v47  ;;  %v2475_v57 = vpack.c.bf16 %v2471_v48, %v2471_v48  ;;  %v3866_v46 = vld [vmem:[%s4929_s7 + $0x8] sm:$0xff]  }
 0xbf4   : > { %v2716_v41 = vsel %vm1620_vm7, %v2472_v53, 0  ;;  %v2762_v55 = vsel %vm1620_vm7, %v2473_v54, 0  ;;  %v2808_v51 = vsel %vm1620_vm7, %v2474_v56, 0  ;;  %v2854_v52 = vsel %vm1620_vm7, %v2475_v57, 0 }
 0xbf5   : > { %3717 = vmatpush3.bf16.msra.mxu0 %v2716_v41  ;;  %3723 = vmatpush3.bf16.msra.mxu1 %v2762_v55 }
 0xbf6   : > { %3728 = vmatprep.subr.bf16.mxu0 %v4094_v0  ;;  %3734 = vmatprep.subr.bf16.mxu1 %v4094_v0 }
 0xbf8   : > { %3719 = vmatmul.mubr.msk.bf16.vlgmr.msra.gmra.mrb[24].mxu0 %vm1380_vm6, %v2708_v58  ;;  %3725 = vmatmul.mubr.msk.bf16.vlgmr.msra.gmra.mrb[40].mxu1 %vm1380_vm6, %v2709_v59 }
 0xbf9   : > { %3729 = vmatpush3.bf16.msra.mxu0 %v2808_v51  ;;  %3735 = vmatpush3.bf16.msra.mxu1 %v2854_v52 }
 0xbfa   : > { %3730 = vmatprep.mubr.msk.bf16.mxu0 %vm4095_vm0, %v4094_v0  ;;  %3736 = vmatprep.mubr.msk.bf16.mxu1 %vm4095_vm0, %v4094_v0 }
 0xbfb   : > { %3740 = vmatprep.subr.bf16.mxu0 %v4094_v0  ;;  %3748 = vmatprep.subr.bf16.mxu1 %v4094_v0 }
 0xc0d   : > { %v2696_v31 = vpop.xlane.xlu0 %2695 }
 0xc0e   : > { %3925 = vrcp.f32 %v2696_v31 }
 0xc10   : > { %v2699_v27 = vpop.xlane.xlu1 %2698 }
 0xc11   : > { %3927 = vrcp.f32 %v2699_v27 }
 0xc18   : > { %v3926_v44 = vpop.eup %3925 }
 0xc19   : > { %v2706_v62 = vmul.f32 %v3926_v44, %v4734_v60 }
 0xc1b   : > { %v3928_v63 = vpop.eup %3927  ;;  %v2710_v1 = vpack.c.bf16 %v2706_v62, %v2706_v62 }
 0xc1c   : > { %v2707_v2 = vmul.f32 %v3928_v63, %v4736_v61 }
 0xc1d   : > { %3731 = vmatmul.mubr.msk.bf16.vlgmr.msra.gmra.mrb[28].mxu0 %vm1380_vm6, %v2710_v1 }
 0xc1e   : > { %v2711_v3 = vpack.c.bf16 %v2707_v2, %v2707_v2  ;;  %3744 = vmatprep.mubr.msk.bf16.mxu0 %vm4095_vm0, %v4094_v0  ;;  %3741 = vmatpush3.bf16.msra.mxu0 %v3865_v36  ;;  %v3874_v36 = vld [vmem:[%s4935_s13 + $0x28] sm:$0xff]  }
 0xc1f   : > { %3742 = vmatprep.subr.bf16.mxu0 %v4094_v0 }
 0xc20   : > { %3737 = vmatmul.mubr.msk.bf16.vlgmr.msra.gmra.mrb[44].mxu1 %vm1380_vm6, %v2711_v3  ;;  %v3526_v3 = vld [vmem:[#allocation5] ss:$0 sm:$0xff] }
 0xc21   : > { %3752 = vmatprep.mubr.msk.bf16.mxu1 %vm4095_vm0, %v4094_v0 }
 0xc22   : > { %3743 = vmatpush3.bf16.msra.mxu0 %v3866_v46 }
 0xc23   : > { %3756 = vmatprep.subr.bf16.mxu0 %v4094_v0 }
 0xccb   : > { %v2752_v4 = vpop.f32.mrb[24].mxu0  ;;  %v2798_v6 = vpop.f32.mrb[40].mxu1 }
 0xccc   : > { %v3720_v7 = vpop.f32.mrb[25].mxu0  ;;  %v3726_v8 = vpop.f32.mrb[41].mxu1 }
 0xccd   : > { %v2755_v60 = vpop.f32.mrb[26].mxu0  ;;  %v2801_v9 = vpop.f32.mrb[42].mxu1 }
 0xcce   : > { %v3721_v10 = vpop.f32.mrb[27].mxu0  ;;  %v3727_v12 = vpop.f32.mrb[43].mxu1 }
 0xcf0   : > { %v2844_v61 = vpop.f32.mrb[28].mxu0 }
 0xcf1   : > { %v2896_v15 = vcombine.low %v2752_v4, %v2844_v61  ;;  %v2897_v16 = vcombine.high %v2752_v4, %v2844_v61  ;;  %v3732_v17 = vpop.f32.mrb[29].mxu0 }
 0xcf2   : > { %v2847_v20 = vpop.f32.mrb[30].mxu0 }
 0xcf3   : > { %v3733_v13 = vpop.f32.mrb[31].mxu0  ;;  %v2890_v26 = vpop.f32.mrb[44].mxu1  ;;  %v2904_v23 = vrot.slane %v2896_v15, %v4472_v14  ;;  %v2911_v18 = vrot.slane %v2897_v16, %v4472_v14  ;;  %v3867_v20 = vld [vmem:[%s4933_s11] sm:$0xff]  }
 0xcf4   : > { %v2912_v21 = vcombine.low %v2798_v6, %v2890_v26  ;;  %v2913_v28 = vcombine.high %v2798_v6, %v2890_v26  ;;  %v3738_v22 = vpop.f32.mrb[45].mxu1  ;;  %3749 = vmatpush3.bf16.msra.mxu1 %v3867_v20  ;;  %v3868_v13 = vld [vmem:[%s4933_s11 + $0x8] sm:$0xff]  }
 0xcf5   : > { %v2893_v29 = vpop.f32.mrb[46].mxu1  ;;  %3750 = vmatprep.subr.bf16.mxu1 %v4094_v0 }
 0xcf6   : > { %v2920_v19 = vrot.slane %v2912_v21, %v4472_v14  ;;  %v2927_v32 = vrot.slane %v2913_v28, %v4472_v14  ;;  %v3739_v24 = vpop.f32.mrb[47].mxu1  ;;  %v3530_v29 = vld [vmem:[#allocation7] ss:$0 sm:$0xff] }
 0xcf8   : > { %v2928_v33 = vcombine.low %v2904_v23, %v2920_v19  ;;  %v2929_v34 = vcombine.high %v2904_v23, %v2920_v19  ;;  %v2944_v11 = vcombine.low %v2911_v18, %v2927_v32  ;;  %v2945_v35 = vcombine.high %v2911_v18, %v2927_v32  ;;  %3751 = vmatpush3.bf16.msra.mxu1 %v3868_v13  ;;  %v3531_v18 = vld [vmem:[%s4932_s10] ss:$0 sm:$0xff] }
 0xcfa   : > { %v2936_v37 = vrot.slane %v2928_v33, %v4475_v25  ;;  %v2943_v38 = vrot.slane %v2929_v34, %v4475_v25  ;;  %v2952_v39 = vrot.slane %v2944_v11, %v4475_v25  ;;  %v2959_v40 = vrot.slane %v2945_v35, %v4475_v25  ;;  %v3870_v33 = vld [vmem:[%s4935_s13 + $0x8] sm:$0xff]   ;;  %v3871_v34 = vld [vmem:[%s4935_s13 + $0x10] sm:$0xff]   ;;  %v3872_v11 = vld [vmem:[%s4935_s13 + $0x18] sm:$0xff]  }
 0xcfb   : > { %v3873_v35 = vld [vmem:[%s4935_s13 + $0x20] sm:$0xff]  }
 0xcfc   : > { %v2964_v42 = vcombine.low %v2936_v37, %v2943_v38  ;;  %v3524_v30 = vcombine.high %v2936_v37, %v2943_v38  ;;  %v2980_v43 = vcombine.low %v2952_v39, %v2959_v40  ;;  %v3525_v45 = vcombine.high %v2952_v39, %v2959_v40  ;;  %v3875_v37 = vld [vmem:[%s4935_s13 + $0x30] sm:$0xff]   ;;  %v3876_v38 = vld [vmem:[%s4935_s13 + $0x38] sm:$0xff]   ;;  %v3532_v39 = vld [vmem:[%s4934_s12] ss:$0 sm:$0xff] }
 0xcfe   : > { %v2971_v47 = vrot.slane %v2964_v42, %v4472_v14  ;;  %v2979_v48 = vrot.slane %v3524_v30, %v4472_v14  ;;  %v2987_v49 = vrot.slane %v2980_v43, %v4472_v14  ;;  %v2995_v50 = vrot.slane %v3525_v45, %v4472_v14 }
 0xd00   : > { %v2997_v53 = vcombine.high %v2971_v47, %v2979_v48  ;;  %v3013_v54 = vcombine.high %v2987_v49, %v2995_v50  ;;  %v2996_v41 = vcombine.low %v2971_v47, %v2979_v48  ;;  %v3012_v55 = vcombine.low %v2987_v49, %v2995_v50 }
 0xd02   : > { %v3011_v56 = vrot.slane %v2997_v53, %v4475_v25  ;;  %v3027_v57 = vrot.slane %v3013_v54, %v4475_v25  ;;  %v3004_v58 = vrot.slane %v2996_v41, %v4475_v25  ;;  %v3020_v59 = vrot.slane %v3012_v55, %v4475_v25 }
 0xd04   : > { %v3030_v51 = vcombine.low %v3011_v56, %v3027_v57  ;;  %v3029_v52 = vcombine.high %v3004_v58, %v3020_v59  ;;  %v3031_v31 = vcombine.high %v3011_v56, %v3027_v57  ;;  %v3028_v27 = vcombine.low %v3004_v58, %v3020_v59  ;;  %v3536_v56 = vld [vmem:[%s4936_s14] ss:$0 sm:$0xff] }
 0xd06   : > { %3037 = vrot.lane.b32.xlu1 %v3030_v51, %s4104_s30  ;;  %3033 = vrot.lane.b32.xlu0 %v3029_v52, %s4105_s23  ;;  %s577_s30 = scalar_lea.vmem [#allocation8], %s3478_s18  ;;  %s4023_s18 = sshll.u32 %s4107_s28, 4  ;;  %s4024_s18 = int_to_ptr.vmem [resolvable:$false] %s4023_s18 }
 0xd07   : > { %s3378_s23 = sshll.u32 %s577_s30, 4  ;;  %s4881_s23 = int_to_ptr.vmem [resolvable:$true] %s3378_s23 }
 0xd08   : > { %s4019_s27 = scalar_lea.vmem %s4881_s23, 128  ;;  %p4026_p4 = scmp.lt.s32.totalorder %s4881_s23, %s4024_s18 }
 0xd09   : > { %p4020_p12 = scmp.ne.s32.totalorder %s4881_s23, %s4019_s27 }
 0xd0a   : > { %3041 = vrot.lane.b32.xlu0 %v3031_v31, %s4106_s15 }
 0xd0b   : > { %p4021_p2 = pnand %p4020_p12, %p4986_p10 }
 0xd0d   : > { %p4022_p3 = pneg %p4021_p2 }
 0xd78   : > { %v3034_v14 = vpop.permute.xlu0 %3033  ;;  %v3038_v44 = vpop.permute.xlu1 %3037 }
 0xd79   : > { %v3044_v62 = vsel %vm1380_vm6, %v3028_v27, %v3034_v14 }
 0xd7a   : > { %v3045_v1 = vsel %vm1951_vm8, %v3044_v62, %v3038_v44 }
 0xd7c   : > { %v3042_v63 = vpop.permute.xlu0 %3041 }
 0xd7d   : > { %v3046_v2 = vsel %vm1953_vm9, %v3045_v1, %v3042_v63 }
 0xd7e   : > { %v3051_v25 = vpack.c.bf16 %v3046_v2, %v3046_v2 }
 0xd80   : > { %3745 = vmatmul.mubr.msk.bf16.vlgmr.msra.gmra.mrb[32].mxu0 %vm610_vm1, %v3051_v25 }
 0xd81   : > { %3772 = vmatprep.mubr.msk.bf16.mxu0 %vm4095_vm0, %v4094_v0 }
 0xe53   : > { %v3108_v4 = vpop.f32.mrb[32].mxu0 }
 0xe54   : > { %v3109_v6 = vadd.f32 %v3526_v3, %v3108_v4  ;;  %v3746_v7 = vpop.f32.mrb[33].mxu0 }
 0xe55   : > { %v3111_v8 = vpop.f32.mrb[34].mxu0 }
 0xe56   : > { %v3747_v60 = vpop.f32.mrb[35].mxu0  ;;  %v3114_v9 = vadd.f32 %v3109_v6, %v4362_v5  ;;  %v3869_v5 = vld [vmem:[%s4935_s13] sm:$0xff]  }
 0xe57   : > { %3757 = vmatpush3.bf16.msra.mxu0 %v3869_v5  ;;  %v3545_v6 = vld [vmem:[%s4982_s20] ss:$0 sm:$0xff]  ;;  %s4025_s20 = scalar_lea.vmem %s4024_s18, 256 }
 0xe58   : > { %v3117_v10 = vsel %vm610_vm1, %v3114_v9, 0.0  ;;  %3758 = vmatprep.subr.bf16.mxu0 %v4094_v0  ;;  %v3546_v8 = vld [vmem:[%s4983_s0] ss:$0 sm:$0xff]  ;;  %p4027_p7 = scmp.lt.s32.totalorder %s4025_s20, %s4019_s27 }
 0xe59   : > { %3118 = vadd.xlane.f32.xlu1 %v3117_v10 }
 0xe5a   : > { %p4028_p8 = por %p4027_p7, %p4026_p4 }
 0xe5b   : > { %3759 = vmatpush3.bf16.msra.mxu0 %v3870_v33 }
 0xe5c   : > { %3760 = vmatprep.subr.bf16.mxu0 %v4094_v0  ;;  %p4029_p11 = pnand %p4028_p8, %p4022_p3 }
 0xe5f   : > { %3761 = vmatpush3.bf16.msra.mxu0 %v3871_v34 }
 0xe60   : > { %3762 = vmatprep.subr.bf16.mxu0 %v4094_v0 }
 0xe63   : > { %3763 = vmatpush3.bf16.msra.mxu0 %v3872_v11 }
 0xe64   : > { %3764 = vmatprep.subr.bf16.mxu0 %v4094_v0 }
 0xe67   : > { %3765 = vmatpush3.bf16.msra.mxu0 %v3873_v35 }
 0xe68   : > { %3766 = vmatprep.subr.bf16.mxu0 %v4094_v0 }
 0xe6b   : > { %3767 = vmatpush3.bf16.msra.mxu0 %v3874_v36 }
 0xe6c   : > { %3768 = vmatprep.subr.bf16.mxu0 %v4094_v0 }
 0xe6f   : > { %3769 = vmatpush3.bf16.msra.mxu0 %v3875_v37 }
 0xe70   : > { %3770 = vmatprep.subr.bf16.mxu0 %v4094_v0 }
 0xe73   : > { %3771 = vmatpush3.bf16.msra.mxu0 %v3876_v38 }
 0xee6   : > { %v3119_v12 = vpop.xlane.xlu1 %3118 }
 0xee7   : > { %v3121_v61 = vmul.f32 0.03125, %v3119_v12 }
 0xee9   : > { %v3122_v15 = vsub.f32 %v3114_v9, %v3121_v61 }
 0xeeb   : > { %v3123_v16 = vmul.f32 %v3122_v15, %v3122_v15 }
 0xeed   : > { %v3124_v17 = vsel %vm610_vm1, %v3123_v16, 0.0 }
 0xeee   : > { %3125 = vadd.xlane.f32.xlu0 %v3124_v17 }
 0xf7b   : > { %v3126_v26 = vpop.xlane.xlu0 %3125 }
 0xf7c   : > { %v3127_v21 = vmul.f32 0.03125, %v3126_v26 }
 0xf7e   : > { %v3128_v28 = vadd.f32 1e-05, %v3127_v21 }
 0xf80   : > { %3929 = vrsqrt.f32 %v3128_v28 }
 0xf8a   : > { %v3930_v22 = vpop.eup %3929 }
 0xf8b   : > { %v3130_v23 = vmul.f32 %v3930_v22, %v3122_v15 }
 0xf8d   : > { %v3137_v19 = vmul.f32 %v3530_v29, %v3130_v23 }
 0xf8f   : > { %v3144_v32 = vadd.f32 %v3531_v18, %v3137_v19 }
 0xf91   : > { %v3145_v24 = vpack.c.bf16 %v3144_v32, %v3144_v32 }
 0xf93   : > { %3753 = vmatmul.mubr.msk.bf16.vlgmr.msra.gmra.mrb[48].mxu1 %vm610_vm1, %v3145_v24 }
0x1066   : > { %v3206_v40 = vpop.f32.mrb[48].mxu1 }
0x1067   : > { %v3207_v42 = vadd.f32 %v3532_v39, %v3206_v40  ;;  %v3754_v30 = vpop.f32.mrb[49].mxu1 }
0x1068   : > { %v3209_v43 = vpop.f32.mrb[50].mxu1 }
0x1069   : > { %v3213_v45 = vmul.f32 0.044715, %v3207_v42  ;;  %v3755_v46 = vpop.f32.mrb[51].mxu1  ;;  %v3212_v54 = vmul.f32 0.5, %v3207_v42 }
0x106b   : > { %v3214_v47 = vmul.f32 %v3213_v45, %v3207_v42 }
0x106d   : > { %v3215_v48 = vmul.f32 %v3214_v47, %v3207_v42 }
0x106f   : > { %v3216_v49 = vadd.f32 %v3215_v48, %v3207_v42 }
0x1071   : > { %v3217_v50 = vmul.f32 0.7978846, %v3216_v49 }
0x1073   : > { %3931 = vtanh.f32 %v3217_v50 }
0x107d   : > { %v3932_v53 = vpop.eup %3931 }
0x107e   : > { %v3219_v41 = vadd.f32 1.0, %v3932_v53 }
0x1080   : > { %v3220_v0 = vmul.f32 %v3219_v41, %v3212_v54 }
0x1082   : > { %v3221_v55 = vpack.c.bf16 %v3220_v0, %v3220_v0 }
0x1084   : > { %3773 = vmatmul.mubr.bf16.vlgmr.msra.gmra.mrb[36].mxu0 %v3221_v55 }
0x1157   : > { %v3327_v57 = vpop.f32.mrb[36].mxu0 }
0x1158   : > { %v3328_v58 = vadd.f32 %v3536_v56, %v3327_v57  ;;  %v3774_v59 = vpop.f32.mrb[37].mxu0 }
0x1159   : > { %v3330_v51 = vpop.f32.mrb[38].mxu0 }
0x115a   : > { %v3775_v52 = vpop.f32.mrb[39].mxu0  ;;  %v3333_v31 = vadd.f32 %v3328_v58, %v3144_v32 }
0x115c   : > { %v3336_v27 = vsel %vm610_vm1, %v3333_v31, 0.0 }
0x115d   : > { %3337 = vadd.xlane.f32.xlu0 %v3336_v27 }
0x11ea   : > { %v3338_v14 = vpop.xlane.xlu0 %3337 }
0x11eb   : > { %v3339_v44 = vmul.f32 0.03125, %v3338_v14 }
0x11ed   : > { %v3340_v62 = vsub.f32 %v3333_v31, %v3339_v44 }
0x11ef   : > { %v3341_v63 = vmul.f32 %v3340_v62, %v3340_v62 }
0x11f1   : > { %v3342_v1 = vsel %vm610_vm1, %v3341_v63, 0.0 }
0x11f2   : > { %3343 = vadd.xlane.f32.xlu1 %v3342_v1 }
0x127f   : > { %v3344_v2 = vpop.xlane.xlu1 %3343 }
0x1280   : > { %v3345_v25 = vmul.f32 0.03125, %v3344_v2 }
0x1282   : > { %v3346_v3 = vadd.f32 1e-05, %v3345_v25 }
0x1284   : > { %3933 = vrsqrt.f32 %v3346_v3 }
0x128e   : > { %v3934_v4 = vpop.eup %3933 }
0x128f   : > { %v3348_v7 = vmul.f32 %v3934_v4, %v3340_v62 }
0x1291   : > { %v3355_v60 = vmul.f32 %v3545_v6, %v3348_v7 }
0x1293   : > { %v3362_v9 = vadd.f32 %v3546_v8, %v3355_v60 }
0x1295   : > { %3363 = vst.msk [vmem:[%s577_s30] sm:$0xff] %vm610_vm1, %v3362_v9 }
0x1296   : > { %4032 = shalt.err (!%p4029_p11)
}
0x1297   : > { %s4033_s21 = scalar_lea.hbm %s4879_s3, 128  ;;  %s4037_s0 = scalar_lea.hbm %s4985_s2, 256 }
0x1298   : > { %p4034_p13 = scmp.ne.s32.totalorder %s4879_s3, %s4033_s21  ;;  %p4038_p6 = scmp.lt.u32.totalorder %s4879_s3, %s4985_s2 }
0x1299   : > { %p4039_p5 = scmp.lt.u32.totalorder %s4037_s0, %s4033_s21  ;;  %p4041_p12 = scmp.lt.u32.totalorder %s4033_s21, %s4879_s3 }
0x129a   : > { %p4035_p0 = pnand %p4034_p13, %p4986_p10 }
0x129b   : > { %p4040_p9 = por %p4039_p5, %p4038_p6 }
0x129c   : > { %p4036_p1 = pneg %p4035_p0 }
0x129d   : > { %p4042_p2 = por %p4041_p12, %p4040_p9 }
0x129f   : > { %p4043_p3 = pnand %p4042_p2, %p4036_p1 }
0x12a1   : > { %4046 = shalt.err (!%p4043_p3)
}
0x12a2   : > { %3788 = dma.vmem_to_hbm [thread:$0]  (%p4986_p10), %s4881_s23, 128, %s4879_s3, %s3365_s1  }
0x12a3 PF: > { %s4987_s15 = sld [smem:[#allocation14_spill]]  ;;  %s4988_s16 = sld [smem:[#allocation12_spill]] }
0x12a4   : > { %s4989_s26 = sld [smem:[#allocation18_spill]] }
0x12a9   : > { %p3810_p4 = scmp.ge.s32.totalorder %s4987_s15, 2  ;;  %s3390_s27 = sand.u32 1, %s4988_s16  }
0x12aa   : > { %p4990_p7 = scmp.ne.s32.totalorder %s4989_s26, 0  ;;  %s3391_s28 = scalar_lea.sflag [#allocation4], %s3390_s27 }
0x12ac   : > { %p3801_p8 = pnand %p3810_p4, %p4990_p7 }
0x12ae   : > { %4072 = dma.done.wait (!%p3801_p8), %s3391_s28, 128  }
0x12af   : > { %4074 = vsyncadd (!%p3801_p8), %s3391_s28, 4294967168  ;;  %s4991_s27 = sld [smem:[#allocation15_spill]]  ;;  %s4992_s18 = sld [smem:[#allocation13_spill]] }
0x12b0   : > { %s4993_s26 = sld [smem:[#allocation16_spill]]  ;;  %s4994_s24 = smov %s4081_s25 }
0x12b5   : > { %p29_p11 = scmp.ge.s32.totalorder %s4991_s27, 4   ;;  %s4995_s25 = smov %s4992_s18 }
0x12b7   :  { %31 = sbr.rel (!%p29_p11) target bundleno = 13 (0xd), region = 136 }
0x12be   :  { %3396 = vsyncpa [#allocation3], 1 }
0x12bf   :  { %3398 = vsyncpa [#allocation3 + $0x1], 1 }
0x12c0   :  { %3399 = vsyncpa [#allocation6], 1 }
0x12c1   :  { %3400 = vsyncpa [#allocation4], 1 }
0x12c2   :  { %3402 = vsyncpa [#allocation4 + $0x1], 1 }

</bundles_post_ra>
